<compile_context>
chip_gen: v6e
topology: v6e:2x2x1
jax: 0.10.0
libtpu: 0.0.40
codegen_flags: <defaults>
</compile_context>

<pallas_src>
import functools

import jax
import jax.numpy as jnp
from jax.experimental import pallas as pl
from jax.experimental.pallas import tpu as pltpu


def _lstm_chunk_kernel(x_ref, wx_ref, wh_ref, b_ref, h0_ref, c0_ref,
                       out_ref, h_out_ref, c_out_ref,
                       h_scr, c_scr, gx_scr, *, hidden, chunk, t_real):
    """One grid step = `chunk` timesteps for one batch block."""
    ti = pl.program_id(1)

    @pl.when(ti == 0)
    def _():
        h_scr[...] = h0_ref[...].astype(jnp.float32)
        c_scr[...] = c0_ref[...].astype(jnp.float32)

    wx = wx_ref[...]               # (I, 4H)  bf16
    wh = wh_ref[...]               # (H, 4H)  bf16
    bias = b_ref[...]              # (1, 4H)  f32

    # ---- Phase 1: hoisted input projection for the whole chunk -> VMEM
    # scratch.  One 2-D MXU matmul per step, no reshape of the 3-D x block.
    def proj_step(s, carry):
        gx_scr[s] = (jnp.dot(x_ref[s].astype(jnp.bfloat16), wx,
                             preferred_element_type=jnp.float32) + bias)
        return carry

    jax.lax.fori_loop(0, chunk, proj_step, 0, unroll=True)

    # ---- Phase 2: sequential recurrence -- only h @ Wh on the critical path.
    mask_tail = (t_real % chunk) != 0   # static python bool

    def rec_step(s, carry):
        h, c = carry
        gates = gx_scr[s] + jnp.dot(h.astype(jnp.bfloat16), wh,
                                    preferred_element_type=jnp.float32)
        sig = jax.nn.sigmoid(gates[:, :3 * hidden])        # fused i|f|o
        i_g = sig[:, 0 * hidden:1 * hidden]
        f_g = sig[:, 1 * hidden:2 * hidden]
        o_g = sig[:, 2 * hidden:3 * hidden]
        c_t = jnp.tanh(gates[:, 3 * hidden:4 * hidden])
        c_new = f_g * c + i_g * c_t
        h_new = o_g * jnp.tanh(c_new)
        out_ref[s] = h_new.astype(out_ref.dtype)            # lane-dense store
        if mask_tail:  # only compiled in when T % chunk != 0
            valid = (ti * chunk + s) < t_real
            c_new = jnp.where(valid, c_new, c)
            h_new = jnp.where(valid, h_new, h)
        return (h_new, c_new)

    h, c = jax.lax.fori_loop(0, chunk, rec_step,
                             (h_scr[...], c_scr[...]), unroll=True)
    h_scr[...] = h
    c_scr[...] = c

    # Final (H, C) written once, on the last time chunk.
    @pl.when(ti == pl.num_programs(1) - 1)
    def _():
        h_out_ref[...] = h.astype(h_out_ref.dtype)
        c_out_ref[...] = c.astype(c_out_ref.dtype)


def _round_up(x, m):
    return -(-x // m) * m


def _pick_batch_block(B):
    """Fill the MXU M dimension (h @ Wh is serial) and, when possible, leave
    >= 2 batch blocks so a v7x megacore can split the batch."""
    for bb in (256, 128):
        if B % bb == 0 and B // bb >= 2:
            return bb
    for bb in (256, 128):
        if B % bb == 0:
            return bb
    return B


def _vmem_capacity_bytes():
    try:
        cap = pltpu.get_tpu_info().vmem_capacity_bytes
        if cap:
            return int(cap)
    except Exception:
        pass
    return 64 * 2**20   # conservative: v7x per-TensorCore VMEM


def lstm_one_forward(inputs, wx, wh, b, *, state=None, time_chunk=None,
                     batch_block=None, out_dtype=jnp.float32):
    """inputs: (T, B, input_size); returns (outputs (T,B,H), (H_final, C_final))."""
    T, B, input_size = inputs.shape
    hidden = wh.shape[0]
    assert wx.shape == (input_size, 4 * hidden)
    assert wh.shape == (hidden, 4 * hidden)
    assert b.shape == (1, 4 * hidden)

    bb = batch_block if batch_block is not None else _pick_batch_block(B)
    assert B % bb == 0
    nb = B // bb

    tc = time_chunk if time_chunk is not None else min(T, 16)
    nt = -(-T // tc)
    T_pad = nt * tc
    x = inputs
    if T_pad != T:
        x = jnp.pad(inputs, ((0, T_pad - T), (0, 0), (0, 0)))

    if state is None:
        h0 = jnp.zeros((B, hidden), jnp.float32)
        c0 = jnp.zeros((B, hidden), jnp.float32)
    else:
        h0, c0 = state
        h0 = h0.astype(jnp.float32)
        c0 = c0.astype(jnp.float32)

    # bf16 weights: halves weight DMA bytes and VMEM residency; MXU multiplies
    # in bf16 at default precision anyway, accumulation stays f32.
    wx_bf = wx.astype(jnp.bfloat16)
    wh_bf = wh.astype(jnp.bfloat16)
    b_f32 = b.astype(jnp.float32)

    # ---- VMEM residency estimate (lane/sublane padded) and per-chip cap.
    out_bytes = jnp.dtype(out_dtype).itemsize
    f32, bf16 = 4, 2
    isz_l = _round_up(input_size, 128)
    h_l = _round_up(hidden, 128)
    h4_l = _round_up(4 * hidden, 128)
    bb_s = _round_up(bb, 8)
    resident = (
        2 * tc * bb_s * isz_l * f32                      # x blocks (dbl buffered)
        + 2 * _round_up(input_size, 16) * h4_l * bf16    # Wx
        + 2 * _round_up(hidden, 16) * h4_l * bf16        # Wh
        + 2 * 8 * h4_l * f32                             # bias
        + 2 * 2 * bb_s * h_l * f32                       # h0 / c0 blocks
        + 2 * tc * bb_s * h_l * out_bytes                # out blocks
        + 2 * 2 * bb_s * h_l * f32                       # h_out / c_out blocks
        + 2 * bb_s * h_l * f32                           # H / C scratch
        + tc * bb_s * h4_l * f32                         # gx scratch
    )
    cap = _vmem_capacity_bytes()
    vmem_limit = int(min(cap - 8 * 2**20,
                         max(int(1.25 * resident), 32 * 2**20)))
    vmem_limit = max(vmem_limit, 16 * 2**20)

    kernel = functools.partial(_lstm_chunk_kernel, hidden=hidden, chunk=tc,
                               t_real=T)

    outputs, h_final, c_final = pl.pallas_call(
        kernel,
        out_shape=(
            jax.ShapeDtypeStruct((T_pad, B, hidden), out_dtype),
            jax.ShapeDtypeStruct((B, hidden), jnp.float32),
            jax.ShapeDtypeStruct((B, hidden), jnp.float32),
        ),
        grid_spec=pltpu.PrefetchScalarGridSpec(
            num_scalar_prefetch=0,
            grid=(nb, nt),
            in_specs=[
                pl.BlockSpec((tc, bb, input_size), lambda bi, ti: (ti, bi, 0)),
                pl.BlockSpec((input_size, 4 * hidden), lambda bi, ti: (0, 0)),
                pl.BlockSpec((hidden, 4 * hidden), lambda bi, ti: (0, 0)),
                pl.BlockSpec((1, 4 * hidden), lambda bi, ti: (0, 0)),
                pl.BlockSpec((bb, hidden), lambda bi, ti: (bi, 0)),
                pl.BlockSpec((bb, hidden), lambda bi, ti: (bi, 0)),
            ],
            out_specs=(
                pl.BlockSpec((tc, bb, hidden), lambda bi, ti: (ti, bi, 0)),
                pl.BlockSpec((bb, hidden), lambda bi, ti: (bi, 0)),
                pl.BlockSpec((bb, hidden), lambda bi, ti: (bi, 0)),
            ),
            scratch_shapes=[
                pltpu.VMEM((bb, hidden), jnp.float32),           # H
                pltpu.VMEM((bb, hidden), jnp.float32),           # C
                pltpu.VMEM((tc, bb, 4 * hidden), jnp.float32),   # gx
            ],
        ),
        compiler_params=pltpu.CompilerParams(
            dimension_semantics=("parallel", "arbitrary"),
            vmem_limit_bytes=vmem_limit),
    )(x, wx_bf, wh_bf, b_f32, h0, c0)

    if T_pad != T:
        outputs = outputs[:T]
    return outputs, (h_final, c_final)


def _reference_lstm(inputs, wx, wh, b, state=None):
    """Pure-JAX reference matching the PyTorch module semantics."""
    T, B, _ = inputs.shape
    hidden = wh.shape[0]
    if state is None:
        state = (jnp.zeros((B, hidden), jnp.float32),
                 jnp.zeros((B, hidden), jnp.float32))

    def step(carry, xt):
        h, c = carry
        gates = xt @ wx + h @ wh + b[0]
        i = jax.nn.sigmoid(gates[:, 0 * hidden:1 * hidden])
        f = jax.nn.sigmoid(gates[:, 1 * hidden:2 * hidden])
        o = jax.nn.sigmoid(gates[:, 2 * hidden:3 * hidden])
        ct = jnp.tanh(gates[:, 3 * hidden:4 * hidden])
        c = f * c + i * ct
        h = o * jnp.tanh(c)
        return (h, c), h

    (h, c), outs = jax.lax.scan(step, state, inputs)
    return outs, (h, c)


if __name__ == "__main__":
    # Small but lane/sublane-friendly shapes: hidden multiple of 128 so gate
    # slices and h-stores are lane-tile aligned; batch multiple of 8.
    T, B = 8, 8
    input_size, hidden = 16, 128

    key = jax.random.PRNGKey(0)
    keys = jax.random.split(key, 12)

    # PyTorch nn.Linear init: U(-1/sqrt(fan_in), 1/sqrt(fan_in)), stored
    # transposed so the kernel does x @ Wx / h @ Wh.  Module biases are zeros;
    # small random values here exercise the bias path (same semantics).
    def lin(k, fan_in, fan_out):
        bound = 1.0 / jnp.sqrt(fan_in)
        return jax.random.uniform(k, (fan_in, fan_out), jnp.float32, -bound, bound)

    W_xi, W_hi = lin(keys[0], input_size, hidden), lin(keys[1], hidden, hidden)
    W_xf, W_hf = lin(keys[2], input_size, hidden), lin(keys[3], hidden, hidden)
    W_xo, W_ho = lin(keys[4], input_size, hidden), lin(keys[5], hidden, hidden)
    W_xc, W_hc = lin(keys[6], input_size, hidden), lin(keys[7], hidden, hidden)

    wx = jnp.concatenate([W_xi, W_xf, W_xo, W_xc], axis=1)   # (input, 4*hidden)
    wh = jnp.concatenate([W_hi, W_hf, W_ho, W_hc], axis=1)   # (hidden, 4*hidden)
    b = 0.1 * jax.random.normal(keys[8], (1, 4 * hidden), jnp.float32)

    inputs = jax.random.normal(keys[9], (T, B, input_size), jnp.float32)

    # Check 1: default path (zero initial state), T a multiple of the chunk.
    outs, (h_f, c_f) = lstm_one_forward(inputs, wx, wh, b)
    jax.block_until_ready((outs, h_f, c_f))
    ref_outs, (ref_h, ref_c) = _reference_lstm(inputs, wx, wh, b)
    assert jnp.allclose(outs, ref_outs, atol=5e-3, rtol=5e-3)
    assert jnp.allclose(h_f, ref_h, atol=5e-3, rtol=5e-3)
    assert jnp.allclose(c_f, ref_c, atol=5e-3, rtol=5e-3)

    # Check 2: explicit initial state + ragged T (exercises the masked tail).
    T2 = 10
    inputs2 = jax.random.normal(keys[10], (T2, B, input_size), jnp.float32)
    h0 = 0.5 * jax.random.normal(keys[11], (B, hidden), jnp.float32)
    c0 = 0.5 * jax.random.normal(jax.random.PRNGKey(1), (B, hidden), jnp.float32)
    outs2, (h_f2, c_f2) = lstm_one_forward(inputs2, wx, wh, b,
                                           state=(h0, c0), time_chunk=4)
    jax.block_until_ready((outs2, h_f2, c_f2))
    ref_outs2, (ref_h2, ref_c2) = _reference_lstm(inputs2, wx, wh, b,
                                                  state=(h0, c0))
    assert jnp.allclose(outs2, ref_outs2, atol=5e-3, rtol=5e-3)
    assert jnp.allclose(h_f2, ref_h2, atol=5e-3, rtol=5e-3)
    assert jnp.allclose(c_f2, ref_c2, atol=5e-3, rtol=5e-3)

    print("KERNEL_OK")
</pallas_src>

<mosaic_0001>
module attributes {stable_mosaic.version = 11 : i64} {
  func.func @_lstm_chunk_kernel(%arg0: i32, %arg1: i32, %arg2: memref<8x8x16xf32, #tpu.memory_space<vmem>>, %arg3: memref<16x512xbf16, #tpu.memory_space<vmem>>, %arg4: memref<128x512xbf16, #tpu.memory_space<vmem>>, %arg5: memref<1x512xf32, #tpu.memory_space<vmem>>, %arg6: memref<8x128xf32, #tpu.memory_space<vmem>>, %arg7: memref<8x128xf32, #tpu.memory_space<vmem>>, %arg8: memref<8x8x128xf32, #tpu.memory_space<vmem>>, %arg9: memref<8x128xf32, #tpu.memory_space<vmem>>, %arg10: memref<8x128xf32, #tpu.memory_space<vmem>>, %arg11: memref<8x128xf32, #tpu.memory_space<vmem>>, %arg12: memref<8x128xf32, #tpu.memory_space<vmem>>, %arg13: memref<8x8x512xf32, #tpu.memory_space<vmem>>) attributes {dimension_semantics = [#tpu.dimension_semantics<parallel>, #tpu.dimension_semantics<arbitrary>], iteration_bounds = array<i64: 1, 1>, scalar_prefetch = 0 : i64, scratch_operands = 3 : i64, tpu.core_type = #tpu.core_type<tc>, window_params = [{transform_indices = @transform_0, window_bounds = array<i64: 8, 8, 16>}, {pipeline_mode = #tpu.pipeline_mode<synchronous>, transform_indices = @transform_1, window_bounds = array<i64: 16, 512>}, {pipeline_mode = #tpu.pipeline_mode<synchronous>, transform_indices = @transform_2, window_bounds = array<i64: 128, 512>}, {pipeline_mode = #tpu.pipeline_mode<synchronous>, transform_indices = @transform_3, window_bounds = array<i64: 1, 512>}, {transform_indices = @transform_4, window_bounds = array<i64: 8, 128>}, {transform_indices = @transform_5, window_bounds = array<i64: 8, 128>}, {transform_indices = @transform_6, window_bounds = array<i64: 8, 8, 128>}, {transform_indices = @transform_7, window_bounds = array<i64: 8, 128>}, {transform_indices = @transform_8, window_bounds = array<i64: 8, 128>}]} {
    %c0_i32 = arith.constant 0 : i32
    %0 = arith.cmpi eq, %arg1, %c0_i32 : i32
    %1 = arith.extui %0 : i1 to i32
    %c0_i32_0 = arith.constant 0 : i32
    %2 = arith.cmpi ne, %1, %c0_i32_0 : i32
    scf.if %2 {
      %c0_113 = arith.constant 0 : index
      %c0_114 = arith.constant 0 : index
      %309 = vector.load %arg6[%c0_113, %c0_114] : memref<8x128xf32, #tpu.memory_space<vmem>>, vector<8x128xf32>
      %c0_115 = arith.constant 0 : index
      %c0_116 = arith.constant 0 : index
      %310 = vector.load %arg11[%c0_115, %c0_116] : memref<8x128xf32, #tpu.memory_space<vmem>>, vector<8x128xf32>
      tpu.vector_store %arg11[%c0_115, %c0_116], %309 {strides = array<i32>} : memref<8x128xf32, #tpu.memory_space<vmem>>, vector<8x128xf32>,
      %c0_117 = arith.constant 0 : index
      %c0_118 = arith.constant 0 : index
      %311 = vector.load %arg7[%c0_117, %c0_118] : memref<8x128xf32, #tpu.memory_space<vmem>>, vector<8x128xf32>
      %c0_119 = arith.constant 0 : index
      %c0_120 = arith.constant 0 : index
      %312 = vector.load %arg12[%c0_119, %c0_120] : memref<8x128xf32, #tpu.memory_space<vmem>>, vector<8x128xf32>
      tpu.vector_store %arg12[%c0_119, %c0_120], %311 {strides = array<i32>} : memref<8x128xf32, #tpu.memory_space<vmem>>, vector<8x128xf32>,
    } else {
    }
    %c0 = arith.constant 0 : index
    %c0_1 = arith.constant 0 : index
    %3 = vector.load %arg3[%c0, %c0_1] : memref<16x512xbf16, #tpu.memory_space<vmem>>, vector<16x512xbf16>
    %c0_2 = arith.constant 0 : index
    %c0_3 = arith.constant 0 : index
    %4 = vector.load %arg4[%c0_2, %c0_3] : memref<128x512xbf16, #tpu.memory_space<vmem>>, vector<128x512xbf16>
    %c0_4 = arith.constant 0 : index
    %c0_5 = arith.constant 0 : index
    %5 = vector.load %arg5[%c0_4, %c0_5] : memref<1x512xf32, #tpu.memory_space<vmem>>, vector<1x512xf32>
    %c0_i32_6 = arith.constant 0 : i32
    %6 = arith.index_cast %c0_i32_6 : i32 to index
    %c0_7 = arith.constant 0 : index
    %c0_8 = arith.constant 0 : index
    %7 = vector.load %arg2[%6, %c0_7, %c0_8] : memref<8x8x16xf32, #tpu.memory_space<vmem>>, vector<1x8x16xf32>
    %8 = vector.shape_cast %7 : vector<1x8x16xf32> to vector<8x16xf32>
    %9 = arith.truncf %8 : vector<8x16xf32> to vector<8x16xbf16>
    %cst = arith.constant dense<0.000000e+00> : vector<8x512xf32>
    %10 = tpu.matmul %9, %3, %cst {dimension_numbers = #tpu.dot_dimension_numbers<[1], [0], [0], [1], [0, 0, 1, 1], [], []>} : vector<8x16xbf16>, vector<16x512xbf16>, vector<8x512xf32> -> vector<8x512xf32>
    %11 = vector.broadcast %5 : vector<1x512xf32> to vector<8x512xf32>
    %12 = arith.addf %10, %11 : vector<8x512xf32>
    %13 = arith.index_cast %c0_i32_6 : i32 to index
    %c0_9 = arith.constant 0 : index
    %c0_10 = arith.constant 0 : index
    %14 = vector.load %arg13[%13, %c0_9, %c0_10] : memref<8x8x512xf32, #tpu.memory_space<vmem>>, vector<1x8x512xf32>
    %15 = vector.shape_cast %14 : vector<1x8x512xf32> to vector<8x512xf32>
    %16 = vector.shape_cast %12 : vector<8x512xf32> to vector<1x8x512xf32>
    tpu.vector_store %arg13[%13, %c0_9, %c0_10], %16 {strides = array<i32>} : memref<8x8x512xf32, #tpu.memory_space<vmem>>, vector<1x8x512xf32>,
    %c1_i32 = arith.constant 1 : i32
    %17 = arith.index_cast %c1_i32 : i32 to index
    %c0_11 = arith.constant 0 : index
    %c0_12 = arith.constant 0 : index
    %18 = vector.load %arg2[%17, %c0_11, %c0_12] : memref<8x8x16xf32, #tpu.memory_space<vmem>>, vector<1x8x16xf32>
    %19 = vector.shape_cast %18 : vector<1x8x16xf32> to vector<8x16xf32>
    %20 = arith.truncf %19 : vector<8x16xf32> to vector<8x16xbf16>
    %cst_13 = arith.constant dense<0.000000e+00> : vector<8x512xf32>
    %21 = tpu.matmul %20, %3, %cst_13 {dimension_numbers = #tpu.dot_dimension_numbers<[1], [0], [0], [1], [0, 0, 1, 1], [], []>} : vector<8x16xbf16>, vector<16x512xbf16>, vector<8x512xf32> -> vector<8x512xf32>
    %22 = vector.broadcast %5 : vector<1x512xf32> to vector<8x512xf32>
    %23 = arith.addf %21, %22 : vector<8x512xf32>
    %24 = arith.index_cast %c1_i32 : i32 to index
    %c0_14 = arith.constant 0 : index
    %c0_15 = arith.constant 0 : index
    %25 = vector.load %arg13[%24, %c0_14, %c0_15] : memref<8x8x512xf32, #tpu.memory_space<vmem>>, vector<1x8x512xf32>
    %26 = vector.shape_cast %25 : vector<1x8x512xf32> to vector<8x512xf32>
    %27 = vector.shape_cast %23 : vector<8x512xf32> to vector<1x8x512xf32>
    tpu.vector_store %arg13[%24, %c0_14, %c0_15], %27 {strides = array<i32>} : memref<8x8x512xf32, #tpu.memory_space<vmem>>, vector<1x8x512xf32>,
    %c2_i32 = arith.constant 2 : i32
    %28 = arith.index_cast %c2_i32 : i32 to index
    %c0_16 = arith.constant 0 : index
    %c0_17 = arith.constant 0 : index
    %29 = vector.load %arg2[%28, %c0_16, %c0_17] : memref<8x8x16xf32, #tpu.memory_space<vmem>>, vector<1x8x16xf32>
    %30 = vector.shape_cast %29 : vector<1x8x16xf32> to vector<8x16xf32>
    %31 = arith.truncf %30 : vector<8x16xf32> to vector<8x16xbf16>
    %cst_18 = arith.constant dense<0.000000e+00> : vector<8x512xf32>
    %32 = tpu.matmul %31, %3, %cst_18 {dimension_numbers = #tpu.dot_dimension_numbers<[1], [0], [0], [1], [0, 0, 1, 1], [], []>} : vector<8x16xbf16>, vector<16x512xbf16>, vector<8x512xf32> -> vector<8x512xf32>
    %33 = vector.broadcast %5 : vector<1x512xf32> to vector<8x512xf32>
    %34 = arith.addf %32, %33 : vector<8x512xf32>
    %35 = arith.index_cast %c2_i32 : i32 to index
    %c0_19 = arith.constant 0 : index
    %c0_20 = arith.constant 0 : index
    %36 = vector.load %arg13[%35, %c0_19, %c0_20] : memref<8x8x512xf32, #tpu.memory_space<vmem>>, vector<1x8x512xf32>
    %37 = vector.shape_cast %36 : vector<1x8x512xf32> to vector<8x512xf32>
    %38 = vector.shape_cast %34 : vector<8x512xf32> to vector<1x8x512xf32>
    tpu.vector_store %arg13[%35, %c0_19, %c0_20], %38 {strides = array<i32>} : memref<8x8x512xf32, #tpu.memory_space<vmem>>, vector<1x8x512xf32>,
    %c3_i32 = arith.constant 3 : i32
    %39 = arith.index_cast %c3_i32 : i32 to index
    %c0_21 = arith.constant 0 : index
    %c0_22 = arith.constant 0 : index
    %40 = vector.load %arg2[%39, %c0_21, %c0_22] : memref<8x8x16xf32, #tpu.memory_space<vmem>>, vector<1x8x16xf32>
    %41 = vector.shape_cast %40 : vector<1x8x16xf32> to vector<8x16xf32>
    %42 = arith.truncf %41 : vector<8x16xf32> to vector<8x16xbf16>
    %cst_23 = arith.constant dense<0.000000e+00> : vector<8x512xf32>
    %43 = tpu.matmul %42, %3, %cst_23 {dimension_numbers = #tpu.dot_dimension_numbers<[1], [0], [0], [1], [0, 0, 1, 1], [], []>} : vector<8x16xbf16>, vector<16x512xbf16>, vector<8x512xf32> -> vector<8x512xf32>
    %44 = vector.broadcast %5 : vector<1x512xf32> to vector<8x512xf32>
    %45 = arith.addf %43, %44 : vector<8x512xf32>
    %46 = arith.index_cast %c3_i32 : i32 to index
    %c0_24 = arith.constant 0 : index
    %c0_25 = arith.constant 0 : index
    %47 = vector.load %arg13[%46, %c0_24, %c0_25] : memref<8x8x512xf32, #tpu.memory_space<vmem>>, vector<1x8x512xf32>
    %48 = vector.shape_cast %47 : vector<1x8x512xf32> to vector<8x512xf32>
    %49 = vector.shape_cast %45 : vector<8x512xf32> to vector<1x8x512xf32>
    tpu.vector_store %arg13[%46, %c0_24, %c0_25], %49 {strides = array<i32>} : memref<8x8x512xf32, #tpu.memory_space<vmem>>, vector<1x8x512xf32>,
    %c4_i32 = arith.constant 4 : i32
    %50 = arith.index_cast %c4_i32 : i32 to index
    %c0_26 = arith.constant 0 : index
    %c0_27 = arith.constant 0 : index
    %51 = vector.load %arg2[%50, %c0_26, %c0_27] : memref<8x8x16xf32, #tpu.memory_space<vmem>>, vector<1x8x16xf32>
    %52 = vector.shape_cast %51 : vector<1x8x16xf32> to vector<8x16xf32>
    %53 = arith.truncf %52 : vector<8x16xf32> to vector<8x16xbf16>
    %cst_28 = arith.constant dense<0.000000e+00> : vector<8x512xf32>
    %54 = tpu.matmul %53, %3, %cst_28 {dimension_numbers = #tpu.dot_dimension_numbers<[1], [0], [0], [1], [0, 0, 1, 1], [], []>} : vector<8x16xbf16>, vector<16x512xbf16>, vector<8x512xf32> -> vector<8x512xf32>
    %55 = vector.broadcast %5 : vector<1x512xf32> to vector<8x512xf32>
    %56 = arith.addf %54, %55 : vector<8x512xf32>
    %57 = arith.index_cast %c4_i32 : i32 to index
    %c0_29 = arith.constant 0 : index
    %c0_30 = arith.constant 0 : index
    %58 = vector.load %arg13[%57, %c0_29, %c0_30] : memref<8x8x512xf32, #tpu.memory_space<vmem>>, vector<1x8x512xf32>
    %59 = vector.shape_cast %58 : vector<1x8x512xf32> to vector<8x512xf32>
    %60 = vector.shape_cast %56 : vector<8x512xf32> to vector<1x8x512xf32>
    tpu.vector_store %arg13[%57, %c0_29, %c0_30], %60 {strides = array<i32>} : memref<8x8x512xf32, #tpu.memory_space<vmem>>, vector<1x8x512xf32>,
    %c5_i32 = arith.constant 5 : i32
    %61 = arith.index_cast %c5_i32 : i32 to index
    %c0_31 = arith.constant 0 : index
    %c0_32 = arith.constant 0 : index
    %62 = vector.load %arg2[%61, %c0_31, %c0_32] : memref<8x8x16xf32, #tpu.memory_space<vmem>>, vector<1x8x16xf32>
    %63 = vector.shape_cast %62 : vector<1x8x16xf32> to vector<8x16xf32>
    %64 = arith.truncf %63 : vector<8x16xf32> to vector<8x16xbf16>
    %cst_33 = arith.constant dense<0.000000e+00> : vector<8x512xf32>
    %65 = tpu.matmul %64, %3, %cst_33 {dimension_numbers = #tpu.dot_dimension_numbers<[1], [0], [0], [1], [0, 0, 1, 1], [], []>} : vector<8x16xbf16>, vector<16x512xbf16>, vector<8x512xf32> -> vector<8x512xf32>
    %66 = vector.broadcast %5 : vector<1x512xf32> to vector<8x512xf32>
    %67 = arith.addf %65, %66 : vector<8x512xf32>
    %68 = arith.index_cast %c5_i32 : i32 to index
    %c0_34 = arith.constant 0 : index
    %c0_35 = arith.constant 0 : index
    %69 = vector.load %arg13[%68, %c0_34, %c0_35] : memref<8x8x512xf32, #tpu.memory_space<vmem>>, vector<1x8x512xf32>
    %70 = vector.shape_cast %69 : vector<1x8x512xf32> to vector<8x512xf32>
    %71 = vector.shape_cast %67 : vector<8x512xf32> to vector<1x8x512xf32>
    tpu.vector_store %arg13[%68, %c0_34, %c0_35], %71 {strides = array<i32>} : memref<8x8x512xf32, #tpu.memory_space<vmem>>, vector<1x8x512xf32>,
    %c6_i32 = arith.constant 6 : i32
    %72 = arith.index_cast %c6_i32 : i32 to index
    %c0_36 = arith.constant 0 : index
    %c0_37 = arith.constant 0 : index
    %73 = vector.load %arg2[%72, %c0_36, %c0_37] : memref<8x8x16xf32, #tpu.memory_space<vmem>>, vector<1x8x16xf32>
    %74 = vector.shape_cast %73 : vector<1x8x16xf32> to vector<8x16xf32>
    %75 = arith.truncf %74 : vector<8x16xf32> to vector<8x16xbf16>
    %cst_38 = arith.constant dense<0.000000e+00> : vector<8x512xf32>
    %76 = tpu.matmul %75, %3, %cst_38 {dimension_numbers = #tpu.dot_dimension_numbers<[1], [0], [0], [1], [0, 0, 1, 1], [], []>} : vector<8x16xbf16>, vector<16x512xbf16>, vector<8x512xf32> -> vector<8x512xf32>
    %77 = vector.broadcast %5 : vector<1x512xf32> to vector<8x512xf32>
    %78 = arith.addf %76, %77 : vector<8x512xf32>
    %79 = arith.index_cast %c6_i32 : i32 to index
    %c0_39 = arith.constant 0 : index
    %c0_40 = arith.constant 0 : index
    %80 = vector.load %arg13[%79, %c0_39, %c0_40] : memref<8x8x512xf32, #tpu.memory_space<vmem>>, vector<1x8x512xf32>
    %81 = vector.shape_cast %80 : vector<1x8x512xf32> to vector<8x512xf32>
    %82 = vector.shape_cast %78 : vector<8x512xf32> to vector<1x8x512xf32>
    tpu.vector_store %arg13[%79, %c0_39, %c0_40], %82 {strides = array<i32>} : memref<8x8x512xf32, #tpu.memory_space<vmem>>, vector<1x8x512xf32>,
    %c7_i32 = arith.constant 7 : i32
    %83 = arith.index_cast %c7_i32 : i32 to index
    %c0_41 = arith.constant 0 : index
    %c0_42 = arith.constant 0 : index
    %84 = vector.load %arg2[%83, %c0_41, %c0_42] : memref<8x8x16xf32, #tpu.memory_space<vmem>>, vector<1x8x16xf32>
    %85 = vector.shape_cast %84 : vector<1x8x16xf32> to vector<8x16xf32>
    %86 = arith.truncf %85 : vector<8x16xf32> to vector<8x16xbf16>
    %cst_43 = arith.constant dense<0.000000e+00> : vector<8x512xf32>
    %87 = tpu.matmul %86, %3, %cst_43 {dimension_numbers = #tpu.dot_dimension_numbers<[1], [0], [0], [1], [0, 0, 1, 1], [], []>} : vector<8x16xbf16>, vector<16x512xbf16>, vector<8x512xf32> -> vector<8x512xf32>
    %88 = vector.broadcast %5 : vector<1x512xf32> to vector<8x512xf32>
    %89 = arith.addf %87, %88 : vector<8x512xf32>
    %90 = arith.index_cast %c7_i32 : i32 to index
    %c0_44 = arith.constant 0 : index
    %c0_45 = arith.constant 0 : index
    %91 = vector.load %arg13[%90, %c0_44, %c0_45] : memref<8x8x512xf32, #tpu.memory_space<vmem>>, vector<1x8x512xf32>
    %92 = vector.shape_cast %91 : vector<1x8x512xf32> to vector<8x512xf32>
    %93 = vector.shape_cast %89 : vector<8x512xf32> to vector<1x8x512xf32>
    tpu.vector_store %arg13[%90, %c0_44, %c0_45], %93 {strides = array<i32>} : memref<8x8x512xf32, #tpu.memory_space<vmem>>, vector<1x8x512xf32>,
    %c8_i32 = arith.constant 8 : i32
    %c0_46 = arith.constant 0 : index
    %c0_47 = arith.constant 0 : index
    %94 = vector.load %arg11[%c0_46, %c0_47] : memref<8x128xf32, #tpu.memory_space<vmem>>, vector<8x128xf32>
    %c0_48 = arith.constant 0 : index
    %c0_49 = arith.constant 0 : index
    %95 = vector.load %arg12[%c0_48, %c0_49] : memref<8x128xf32, #tpu.memory_space<vmem>>, vector<8x128xf32>
    %c0_i32_50 = arith.constant 0 : i32
    %96 = arith.index_cast %c0_i32_50 : i32 to index
    %c0_51 = arith.constant 0 : index
    %c0_52 = arith.constant 0 : index
    %97 = vector.load %arg13[%96, %c0_51, %c0_52] : memref<8x8x512xf32, #tpu.memory_space<vmem>>, vector<1x8x512xf32>
    %98 = vector.shape_cast %97 : vector<1x8x512xf32> to vector<8x512xf32>
    %99 = arith.truncf %94 : vector<8x128xf32> to vector<8x128xbf16>
    %cst_53 = arith.constant dense<0.000000e+00> : vector<8x512xf32>
    %100 = tpu.matmul %99, %4, %cst_53 {dimension_numbers = #tpu.dot_dimension_numbers<[1], [0], [0], [1], [0, 0, 1, 1], [], []>} : vector<8x128xbf16>, vector<128x512xbf16>, vector<8x512xf32> -> vector<8x512xf32>
    %101 = arith.addf %98, %100 : vector<8x512xf32>
    %102 = vector.extract_strided_slice %101 {offsets = [0, 0], sizes = [8, 384], strides = [1, 1]} : vector<8x512xf32> to vector<8x384xf32>
    %103 = arith.negf %102 : vector<8x384xf32>
    %104 = math.exp %103 : vector<8x384xf32>
    %cst_54 = arith.constant 1.000000e+00 : f32
    %105 = vector.broadcast %cst_54 : f32 to vector<8x384xf32>
    %106 = arith.addf %105, %104 : vector<8x384xf32>
    %107 = arith.divf %105, %106 : vector<8x384xf32>
    %108 = vector.extract_strided_slice %107 {offsets = [0, 0], sizes = [8, 128], strides = [1, 1]} : vector<8x384xf32> to vector<8x128xf32>
    %109 = vector.extract_strided_slice %107 {offsets = [0, 128], sizes = [8, 128], strides = [1, 1]} : vector<8x384xf32> to vector<8x128xf32>
    %110 = vector.extract_strided_slice %107 {offsets = [0, 256], sizes = [8, 128], strides = [1, 1]} : vector<8x384xf32> to vector<8x128xf32>
    %111 = vector.extract_strided_slice %101 {offsets = [0, 384], sizes = [8, 128], strides = [1, 1]} : vector<8x512xf32> to vector<8x128xf32>
    %112 = math.tanh %111 : vector<8x128xf32>
    %113 = arith.mulf %109, %95 : vector<8x128xf32>
    %114 = arith.mulf %108, %112 : vector<8x128xf32>
    %115 = arith.addf %113, %114 : vector<8x128xf32>
    %116 = math.tanh %115 : vector<8x128xf32>
    %117 = arith.mulf %110, %116 : vector<8x128xf32>
    %118 = arith.index_cast %c0_i32_50 : i32 to index
    %c0_55 = arith.constant 0 : index
    %c0_56 = arith.constant 0 : index
    %119 = vector.load %arg8[%118, %c0_55, %c0_56] : memref<8x8x128xf32, #tpu.memory_space<vmem>>, vector<1x8x128xf32>
    %120 = vector.shape_cast %119 : vector<1x8x128xf32> to vector<8x128xf32>
    %121 = vector.shape_cast %117 : vector<8x128xf32> to vector<1x8x128xf32>
    tpu.vector_store %arg8[%118, %c0_55, %c0_56], %121 {strides = array<i32>} : memref<8x8x128xf32, #tpu.memory_space<vmem>>, vector<1x8x128xf32>,
    %c1_i32_57 = arith.constant 1 : i32
    %122 = arith.index_cast %c1_i32_57 : i32 to index
    %c0_58 = arith.constant 0 : index
    %c0_59 = arith.constant 0 : index
    %123 = vector.load %arg13[%122, %c0_58, %c0_59] : memref<8x8x512xf32, #tpu.memory_space<vmem>>, vector<1x8x512xf32>
    %124 = vector.shape_cast %123 : vector<1x8x512xf32> to vector<8x512xf32>
    %125 = arith.truncf %117 : vector<8x128xf32> to vector<8x128xbf16>
    %cst_60 = arith.constant dense<0.000000e+00> : vector<8x512xf32>
    %126 = tpu.matmul %125, %4, %cst_60 {dimension_numbers = #tpu.dot_dimension_numbers<[1], [0], [0], [1], [0, 0, 1, 1], [], []>} : vector<8x128xbf16>, vector<128x512xbf16>, vector<8x512xf32> -> vector<8x512xf32>
    %127 = arith.addf %124, %126 : vector<8x512xf32>
    %128 = vector.extract_strided_slice %127 {offsets = [0, 0], sizes = [8, 384], strides = [1, 1]} : vector<8x512xf32> to vector<8x384xf32>
    %129 = arith.negf %128 : vector<8x384xf32>
    %130 = math.exp %129 : vector<8x384xf32>
    %cst_61 = arith.constant 1.000000e+00 : f32
    %131 = vector.broadcast %cst_61 : f32 to vector<8x384xf32>
    %132 = arith.addf %131, %130 : vector<8x384xf32>
    %133 = arith.divf %131, %132 : vector<8x384xf32>
    %134 = vector.extract_strided_slice %133 {offsets = [0, 0], sizes = [8, 128], strides = [1, 1]} : vector<8x384xf32> to vector<8x128xf32>
    %135 = vector.extract_strided_slice %133 {offsets = [0, 128], sizes = [8, 128], strides = [1, 1]} : vector<8x384xf32> to vector<8x128xf32>
    %136 = vector.extract_strided_slice %133 {offsets = [0, 256], sizes = [8, 128], strides = [1, 1]} : vector<8x384xf32> to vector<8x128xf32>
    %137 = vector.extract_strided_slice %127 {offsets = [0, 384], sizes = [8, 128], strides = [1, 1]} : vector<8x512xf32> to vector<8x128xf32>
    %138 = math.tanh %137 : vector<8x128xf32>
    %139 = arith.mulf %135, %115 : vector<8x128xf32>
    %140 = arith.mulf %134, %138 : vector<8x128xf32>
    %141 = arith.addf %139, %140 : vector<8x128xf32>
    %142 = math.tanh %141 : vector<8x128xf32>
    %143 = arith.mulf %136, %142 : vector<8x128xf32>
    %144 = arith.index_cast %c1_i32_57 : i32 to index
    %c0_62 = arith.constant 0 : index
    %c0_63 = arith.constant 0 : index
    %145 = vector.load %arg8[%144, %c0_62, %c0_63] : memref<8x8x128xf32, #tpu.memory_space<vmem>>, vector<1x8x128xf32>
    %146 = vector.shape_cast %145 : vector<1x8x128xf32> to vector<8x128xf32>
    %147 = vector.shape_cast %143 : vector<8x128xf32> to vector<1x8x128xf32>
    tpu.vector_store %arg8[%144, %c0_62, %c0_63], %147 {strides = array<i32>} : memref<8x8x128xf32, #tpu.memory_space<vmem>>, vector<1x8x128xf32>,
    %c2_i32_64 = arith.constant 2 : i32
    %148 = arith.index_cast %c2_i32_64 : i32 to index
    %c0_65 = arith.constant 0 : index
    %c0_66 = arith.constant 0 : index
    %149 = vector.load %arg13[%148, %c0_65, %c0_66] : memref<8x8x512xf32, #tpu.memory_space<vmem>>, vector<1x8x512xf32>
    %150 = vector.shape_cast %149 : vector<1x8x512xf32> to vector<8x512xf32>
    %151 = arith.truncf %143 : vector<8x128xf32> to vector<8x128xbf16>
    %cst_67 = arith.constant dense<0.000000e+00> : vector<8x512xf32>
    %152 = tpu.matmul %151, %4, %cst_67 {dimension_numbers = #tpu.dot_dimension_numbers<[1], [0], [0], [1], [0, 0, 1, 1], [], []>} : vector<8x128xbf16>, vector<128x512xbf16>, vector<8x512xf32> -> vector<8x512xf32>
    %153 = arith.addf %150, %152 : vector<8x512xf32>
    %154 = vector.extract_strided_slice %153 {offsets = [0, 0], sizes = [8, 384], strides = [1, 1]} : vector<8x512xf32> to vector<8x384xf32>
    %155 = arith.negf %154 : vector<8x384xf32>
    %156 = math.exp %155 : vector<8x384xf32>
    %cst_68 = arith.constant 1.000000e+00 : f32
    %157 = vector.broadcast %cst_68 : f32 to vector<8x384xf32>
    %158 = arith.addf %157, %156 : vector<8x384xf32>
    %159 = arith.divf %157, %158 : vector<8x384xf32>
    %160 = vector.extract_strided_slice %159 {offsets = [0, 0], sizes = [8, 128], strides = [1, 1]} : vector<8x384xf32> to vector<8x128xf32>
    %161 = vector.extract_strided_slice %159 {offsets = [0, 128], sizes = [8, 128], strides = [1, 1]} : vector<8x384xf32> to vector<8x128xf32>
    %162 = vector.extract_strided_slice %159 {offsets = [0, 256], sizes = [8, 128], strides = [1, 1]} : vector<8x384xf32> to vector<8x128xf32>
    %163 = vector.extract_strided_slice %153 {offsets = [0, 384], sizes = [8, 128], strides = [1, 1]} : vector<8x512xf32> to vector<8x128xf32>
    %164 = math.tanh %163 : vector<8x128xf32>
    %165 = arith.mulf %161, %141 : vector<8x128xf32>
    %166 = arith.mulf %160, %164 : vector<8x128xf32>
    %167 = arith.addf %165, %166 : vector<8x128xf32>
    %168 = math.tanh %167 : vector<8x128xf32>
    %169 = arith.mulf %162, %168 : vector<8x128xf32>
    %170 = arith.index_cast %c2_i32_64 : i32 to index
    %c0_69 = arith.constant 0 : index
    %c0_70 = arith.constant 0 : index
    %171 = vector.load %arg8[%170, %c0_69, %c0_70] : memref<8x8x128xf32, #tpu.memory_space<vmem>>, vector<1x8x128xf32>
    %172 = vector.shape_cast %171 : vector<1x8x128xf32> to vector<8x128xf32>
    %173 = vector.shape_cast %169 : vector<8x128xf32> to vector<1x8x128xf32>
    tpu.vector_store %arg8[%170, %c0_69, %c0_70], %173 {strides = array<i32>} : memref<8x8x128xf32, #tpu.memory_space<vmem>>, vector<1x8x128xf32>,
    %c3_i32_71 = arith.constant 3 : i32
    %174 = arith.index_cast %c3_i32_71 : i32 to index
    %c0_72 = arith.constant 0 : index
    %c0_73 = arith.constant 0 : index
    %175 = vector.load %arg13[%174, %c0_72, %c0_73] : memref<8x8x512xf32, #tpu.memory_space<vmem>>, vector<1x8x512xf32>
    %176 = vector.shape_cast %175 : vector<1x8x512xf32> to vector<8x512xf32>
    %177 = arith.truncf %169 : vector<8x128xf32> to vector<8x128xbf16>
    %cst_74 = arith.constant dense<0.000000e+00> : vector<8x512xf32>
    %178 = tpu.matmul %177, %4, %cst_74 {dimension_numbers = #tpu.dot_dimension_numbers<[1], [0], [0], [1], [0, 0, 1, 1], [], []>} : vector<8x128xbf16>, vector<128x512xbf16>, vector<8x512xf32> -> vector<8x512xf32>
    %179 = arith.addf %176, %178 : vector<8x512xf32>
    %180 = vector.extract_strided_slice %179 {offsets = [0, 0], sizes = [8, 384], strides = [1, 1]} : vector<8x512xf32> to vector<8x384xf32>
    %181 = arith.negf %180 : vector<8x384xf32>
    %182 = math.exp %181 : vector<8x384xf32>
    %cst_75 = arith.constant 1.000000e+00 : f32
    %183 = vector.broadcast %cst_75 : f32 to vector<8x384xf32>
    %184 = arith.addf %183, %182 : vector<8x384xf32>
    %185 = arith.divf %183, %184 : vector<8x384xf32>
    %186 = vector.extract_strided_slice %185 {offsets = [0, 0], sizes = [8, 128], strides = [1, 1]} : vector<8x384xf32> to vector<8x128xf32>
    %187 = vector.extract_strided_slice %185 {offsets = [0, 128], sizes = [8, 128], strides = [1, 1]} : vector<8x384xf32> to vector<8x128xf32>
    %188 = vector.extract_strided_slice %185 {offsets = [0, 256], sizes = [8, 128], strides = [1, 1]} : vector<8x384xf32> to vector<8x128xf32>
    %189 = vector.extract_strided_slice %179 {offsets = [0, 384], sizes = [8, 128], strides = [1, 1]} : vector<8x512xf32> to vector<8x128xf32>
    %190 = math.tanh %189 : vector<8x128xf32>
    %191 = arith.mulf %187, %167 : vector<8x128xf32>
    %192 = arith.mulf %186, %190 : vector<8x128xf32>
    %193 = arith.addf %191, %192 : vector<8x128xf32>
    %194 = math.tanh %193 : vector<8x128xf32>
    %195 = arith.mulf %188, %194 : vector<8x128xf32>
    %196 = arith.index_cast %c3_i32_71 : i32 to index
    %c0_76 = arith.constant 0 : index
    %c0_77 = arith.constant 0 : index
    %197 = vector.load %arg8[%196, %c0_76, %c0_77] : memref<8x8x128xf32, #tpu.memory_space<vmem>>, vector<1x8x128xf32>
    %198 = vector.shape_cast %197 : vector<1x8x128xf32> to vector<8x128xf32>
    %199 = vector.shape_cast %195 : vector<8x128xf32> to vector<1x8x128xf32>
    tpu.vector_store %arg8[%196, %c0_76, %c0_77], %199 {strides = array<i32>} : memref<8x8x128xf32, #tpu.memory_space<vmem>>, vector<1x8x128xf32>,
    %c4_i32_78 = arith.constant 4 : i32
    %200 = arith.index_cast %c4_i32_78 : i32 to index
    %c0_79 = arith.constant 0 : index
    %c0_80 = arith.constant 0 : index
    %201 = vector.load %arg13[%200, %c0_79, %c0_80] : memref<8x8x512xf32, #tpu.memory_space<vmem>>, vector<1x8x512xf32>
    %202 = vector.shape_cast %201 : vector<1x8x512xf32> to vector<8x512xf32>
    %203 = arith.truncf %195 : vector<8x128xf32> to vector<8x128xbf16>
    %cst_81 = arith.constant dense<0.000000e+00> : vector<8x512xf32>
    %204 = tpu.matmul %203, %4, %cst_81 {dimension_numbers = #tpu.dot_dimension_numbers<[1], [0], [0], [1], [0, 0, 1, 1], [], []>} : vector<8x128xbf16>, vector<128x512xbf16>, vector<8x512xf32> -> vector<8x512xf32>
    %205 = arith.addf %202, %204 : vector<8x512xf32>
    %206 = vector.extract_strided_slice %205 {offsets = [0, 0], sizes = [8, 384], strides = [1, 1]} : vector<8x512xf32> to vector<8x384xf32>
    %207 = arith.negf %206 : vector<8x384xf32>
    %208 = math.exp %207 : vector<8x384xf32>
    %cst_82 = arith.constant 1.000000e+00 : f32
    %209 = vector.broadcast %cst_82 : f32 to vector<8x384xf32>
    %210 = arith.addf %209, %208 : vector<8x384xf32>
    %211 = arith.divf %209, %210 : vector<8x384xf32>
    %212 = vector.extract_strided_slice %211 {offsets = [0, 0], sizes = [8, 128], strides = [1, 1]} : vector<8x384xf32> to vector<8x128xf32>
    %213 = vector.extract_strided_slice %211 {offsets = [0, 128], sizes = [8, 128], strides = [1, 1]} : vector<8x384xf32> to vector<8x128xf32>
    %214 = vector.extract_strided_slice %211 {offsets = [0, 256], sizes = [8, 128], strides = [1, 1]} : vector<8x384xf32> to vector<8x128xf32>
    %215 = vector.extract_strided_slice %205 {offsets = [0, 384], sizes = [8, 128], strides = [1, 1]} : vector<8x512xf32> to vector<8x128xf32>
    %216 = math.tanh %215 : vector<8x128xf32>
    %217 = arith.mulf %213, %193 : vector<8x128xf32>
    %218 = arith.mulf %212, %216 : vector<8x128xf32>
    %219 = arith.addf %217, %218 : vector<8x128xf32>
    %220 = math.tanh %219 : vector<8x128xf32>
    %221 = arith.mulf %214, %220 : vector<8x128xf32>
    %222 = arith.index_cast %c4_i32_78 : i32 to index
    %c0_83 = arith.constant 0 : index
    %c0_84 = arith.constant 0 : index
    %223 = vector.load %arg8[%222, %c0_83, %c0_84] : memref<8x8x128xf32, #tpu.memory_space<vmem>>, vector<1x8x128xf32>
    %224 = vector.shape_cast %223 : vector<1x8x128xf32> to vector<8x128xf32>
    %225 = vector.shape_cast %221 : vector<8x128xf32> to vector<1x8x128xf32>
    tpu.vector_store %arg8[%222, %c0_83, %c0_84], %225 {strides = array<i32>} : memref<8x8x128xf32, #tpu.memory_space<vmem>>, vector<1x8x128xf32>,
    %c5_i32_85 = arith.constant 5 : i32
    %226 = arith.index_cast %c5_i32_85 : i32 to index
    %c0_86 = arith.constant 0 : index
    %c0_87 = arith.constant 0 : index
    %227 = vector.load %arg13[%226, %c0_86, %c0_87] : memref<8x8x512xf32, #tpu.memory_space<vmem>>, vector<1x8x512xf32>
    %228 = vector.shape_cast %227 : vector<1x8x512xf32> to vector<8x512xf32>
    %229 = arith.truncf %221 : vector<8x128xf32> to vector<8x128xbf16>
    %cst_88 = arith.constant dense<0.000000e+00> : vector<8x512xf32>
    %230 = tpu.matmul %229, %4, %cst_88 {dimension_numbers = #tpu.dot_dimension_numbers<[1], [0], [0], [1], [0, 0, 1, 1], [], []>} : vector<8x128xbf16>, vector<128x512xbf16>, vector<8x512xf32> -> vector<8x512xf32>
    %231 = arith.addf %228, %230 : vector<8x512xf32>
    %232 = vector.extract_strided_slice %231 {offsets = [0, 0], sizes = [8, 384], strides = [1, 1]} : vector<8x512xf32> to vector<8x384xf32>
    %233 = arith.negf %232 : vector<8x384xf32>
    %234 = math.exp %233 : vector<8x384xf32>
    %cst_89 = arith.constant 1.000000e+00 : f32
    %235 = vector.broadcast %cst_89 : f32 to vector<8x384xf32>
    %236 = arith.addf %235, %234 : vector<8x384xf32>
    %237 = arith.divf %235, %236 : vector<8x384xf32>
    %238 = vector.extract_strided_slice %237 {offsets = [0, 0], sizes = [8, 128], strides = [1, 1]} : vector<8x384xf32> to vector<8x128xf32>
    %239 = vector.extract_strided_slice %237 {offsets = [0, 128], sizes = [8, 128], strides = [1, 1]} : vector<8x384xf32> to vector<8x128xf32>
    %240 = vector.extract_strided_slice %237 {offsets = [0, 256], sizes = [8, 128], strides = [1, 1]} : vector<8x384xf32> to vector<8x128xf32>
    %241 = vector.extract_strided_slice %231 {offsets = [0, 384], sizes = [8, 128], strides = [1, 1]} : vector<8x512xf32> to vector<8x128xf32>
    %242 = math.tanh %241 : vector<8x128xf32>
    %243 = arith.mulf %239, %219 : vector<8x128xf32>
    %244 = arith.mulf %238, %242 : vector<8x128xf32>
    %245 = arith.addf %243, %244 : vector<8x128xf32>
    %246 = math.tanh %245 : vector<8x128xf32>
    %247 = arith.mulf %240, %246 : vector<8x128xf32>
    %248 = arith.index_cast %c5_i32_85 : i32 to index
    %c0_90 = arith.constant 0 : index
    %c0_91 = arith.constant 0 : index
    %249 = vector.load %arg8[%248, %c0_90, %c0_91] : memref<8x8x128xf32, #tpu.memory_space<vmem>>, vector<1x8x128xf32>
    %250 = vector.shape_cast %249 : vector<1x8x128xf32> to vector<8x128xf32>
    %251 = vector.shape_cast %247 : vector<8x128xf32> to vector<1x8x128xf32>
    tpu.vector_store %arg8[%248, %c0_90, %c0_91], %251 {strides = array<i32>} : memref<8x8x128xf32, #tpu.memory_space<vmem>>, vector<1x8x128xf32>,
    %c6_i32_92 = arith.constant 6 : i32
    %252 = arith.index_cast %c6_i32_92 : i32 to index
    %c0_93 = arith.constant 0 : index
    %c0_94 = arith.constant 0 : index
    %253 = vector.load %arg13[%252, %c0_93, %c0_94] : memref<8x8x512xf32, #tpu.memory_space<vmem>>, vector<1x8x512xf32>
    %254 = vector.shape_cast %253 : vector<1x8x512xf32> to vector<8x512xf32>
    %255 = arith.truncf %247 : vector<8x128xf32> to vector<8x128xbf16>
    %cst_95 = arith.constant dense<0.000000e+00> : vector<8x512xf32>
    %256 = tpu.matmul %255, %4, %cst_95 {dimension_numbers = #tpu.dot_dimension_numbers<[1], [0], [0], [1], [0, 0, 1, 1], [], []>} : vector<8x128xbf16>, vector<128x512xbf16>, vector<8x512xf32> -> vector<8x512xf32>
    %257 = arith.addf %254, %256 : vector<8x512xf32>
    %258 = vector.extract_strided_slice %257 {offsets = [0, 0], sizes = [8, 384], strides = [1, 1]} : vector<8x512xf32> to vector<8x384xf32>
    %259 = arith.negf %258 : vector<8x384xf32>
    %260 = math.exp %259 : vector<8x384xf32>
    %cst_96 = arith.constant 1.000000e+00 : f32
    %261 = vector.broadcast %cst_96 : f32 to vector<8x384xf32>
    %262 = arith.addf %261, %260 : vector<8x384xf32>
    %263 = arith.divf %261, %262 : vector<8x384xf32>
    %264 = vector.extract_strided_slice %263 {offsets = [0, 0], sizes = [8, 128], strides = [1, 1]} : vector<8x384xf32> to vector<8x128xf32>
    %265 = vector.extract_strided_slice %263 {offsets = [0, 128], sizes = [8, 128], strides = [1, 1]} : vector<8x384xf32> to vector<8x128xf32>
    %266 = vector.extract_strided_slice %263 {offsets = [0, 256], sizes = [8, 128], strides = [1, 1]} : vector<8x384xf32> to vector<8x128xf32>
    %267 = vector.extract_strided_slice %257 {offsets = [0, 384], sizes = [8, 128], strides = [1, 1]} : vector<8x512xf32> to vector<8x128xf32>
    %268 = math.tanh %267 : vector<8x128xf32>
    %269 = arith.mulf %265, %245 : vector<8x128xf32>
    %270 = arith.mulf %264, %268 : vector<8x128xf32>
    %271 = arith.addf %269, %270 : vector<8x128xf32>
    %272 = math.tanh %271 : vector<8x128xf32>
    %273 = arith.mulf %266, %272 : vector<8x128xf32>
    %274 = arith.index_cast %c6_i32_92 : i32 to index
    %c0_97 = arith.constant 0 : index
    %c0_98 = arith.constant 0 : index
    %275 = vector.load %arg8[%274, %c0_97, %c0_98] : memref<8x8x128xf32, #tpu.memory_space<vmem>>, vector<1x8x128xf32>
    %276 = vector.shape_cast %275 : vector<1x8x128xf32> to vector<8x128xf32>
    %277 = vector.shape_cast %273 : vector<8x128xf32> to vector<1x8x128xf32>
    tpu.vector_store %arg8[%274, %c0_97, %c0_98], %277 {strides = array<i32>} : memref<8x8x128xf32, #tpu.memory_space<vmem>>, vector<1x8x128xf32>,
    %c7_i32_99 = arith.constant 7 : i32
    %278 = arith.index_cast %c7_i32_99 : i32 to index
    %c0_100 = arith.constant 0 : index
    %c0_101 = arith.constant 0 : index
    %279 = vector.load %arg13[%278, %c0_100, %c0_101] : memref<8x8x512xf32, #tpu.memory_space<vmem>>, vector<1x8x512xf32>
    %280 = vector.shape_cast %279 : vector<1x8x512xf32> to vector<8x512xf32>
    %281 = arith.truncf %273 : vector<8x128xf32> to vector<8x128xbf16>
    %cst_102 = arith.constant dense<0.000000e+00> : vector<8x512xf32>
    %282 = tpu.matmul %281, %4, %cst_102 {dimension_numbers = #tpu.dot_dimension_numbers<[1], [0], [0], [1], [0, 0, 1, 1], [], []>} : vector<8x128xbf16>, vector<128x512xbf16>, vector<8x512xf32> -> vector<8x512xf32>
    %283 = arith.addf %280, %282 : vector<8x512xf32>
    %284 = vector.extract_strided_slice %283 {offsets = [0, 0], sizes = [8, 384], strides = [1, 1]} : vector<8x512xf32> to vector<8x384xf32>
    %285 = arith.negf %284 : vector<8x384xf32>
    %286 = math.exp %285 : vector<8x384xf32>
    %cst_103 = arith.constant 1.000000e+00 : f32
    %287 = vector.broadcast %cst_103 : f32 to vector<8x384xf32>
    %288 = arith.addf %287, %286 : vector<8x384xf32>
    %289 = arith.divf %287, %288 : vector<8x384xf32>
    %290 = vector.extract_strided_slice %289 {offsets = [0, 0], sizes = [8, 128], strides = [1, 1]} : vector<8x384xf32> to vector<8x128xf32>
    %291 = vector.extract_strided_slice %289 {offsets = [0, 128], sizes = [8, 128], strides = [1, 1]} : vector<8x384xf32> to vector<8x128xf32>
    %292 = vector.extract_strided_slice %289 {offsets = [0, 256], sizes = [8, 128], strides = [1, 1]} : vector<8x384xf32> to vector<8x128xf32>
    %293 = vector.extract_strided_slice %283 {offsets = [0, 384], sizes = [8, 128], strides = [1, 1]} : vector<8x512xf32> to vector<8x128xf32>
    %294 = math.tanh %293 : vector<8x128xf32>
    %295 = arith.mulf %291, %271 : vector<8x128xf32>
    %296 = arith.mulf %290, %294 : vector<8x128xf32>
    %297 = arith.addf %295, %296 : vector<8x128xf32>
    %298 = math.tanh %297 : vector<8x128xf32>
    %299 = arith.mulf %292, %298 : vector<8x128xf32>
    %300 = arith.index_cast %c7_i32_99 : i32 to index
    %c0_104 = arith.constant 0 : index
    %c0_105 = arith.constant 0 : index
    %301 = vector.load %arg8[%300, %c0_104, %c0_105] : memref<8x8x128xf32, #tpu.memory_space<vmem>>, vector<1x8x128xf32>
    %302 = vector.shape_cast %301 : vector<1x8x128xf32> to vector<8x128xf32>
    %303 = vector.shape_cast %299 : vector<8x128xf32> to vector<1x8x128xf32>
    tpu.vector_store %arg8[%300, %c0_104, %c0_105], %303 {strides = array<i32>} : memref<8x8x128xf32, #tpu.memory_space<vmem>>, vector<1x8x128xf32>,
    %c8_i32_106 = arith.constant 8 : i32
    %c0_107 = arith.constant 0 : index
    %c0_108 = arith.constant 0 : index
    %304 = vector.load %arg11[%c0_107, %c0_108] : memref<8x128xf32, #tpu.memory_space<vmem>>, vector<8x128xf32>
    tpu.vector_store %arg11[%c0_107, %c0_108], %299 {strides = array<i32>} : memref<8x128xf32, #tpu.memory_space<vmem>>, vector<8x128xf32>,
    %c0_109 = arith.constant 0 : index
    %c0_110 = arith.constant 0 : index
    %305 = vector.load %arg12[%c0_109, %c0_110] : memref<8x128xf32, #tpu.memory_space<vmem>>, vector<8x128xf32>
    tpu.vector_store %arg12[%c0_109, %c0_110], %297 {strides = array<i32>} : memref<8x128xf32, #tpu.memory_space<vmem>>, vector<8x128xf32>,
    %c0_i32_111 = arith.constant 0 : i32
    %306 = arith.cmpi eq, %arg1, %c0_i32_111 : i32
    %307 = arith.extui %306 : i1 to i32
    %c0_i32_112 = arith.constant 0 : i32
    %308 = arith.cmpi ne, %307, %c0_i32_112 : i32
    scf.if %308 {
      %c0_113 = arith.constant 0 : index
      %c0_114 = arith.constant 0 : index
      %309 = vector.load %arg9[%c0_113, %c0_114] : memref<8x128xf32, #tpu.memory_space<vmem>>, vector<8x128xf32>
      tpu.vector_store %arg9[%c0_113, %c0_114], %299 {strides = array<i32>} : memref<8x128xf32, #tpu.memory_space<vmem>>, vector<8x128xf32>,
      %c0_115 = arith.constant 0 : index
      %c0_116 = arith.constant 0 : index
      %310 = vector.load %arg10[%c0_115, %c0_116] : memref<8x128xf32, #tpu.memory_space<vmem>>, vector<8x128xf32>
      tpu.vector_store %arg10[%c0_115, %c0_116], %297 {strides = array<i32>} : memref<8x128xf32, #tpu.memory_space<vmem>>, vector<8x128xf32>,
    } else {
    }
    return
  }
  func.func @transform_0(%arg0: i32, %arg1: i32) -> (i32, i32, i32) {
    %c0_i32 = arith.constant 0 : i32
    %c0_i32_0 = arith.constant 0 : i32
    return %arg1, %arg0, %c0_i32 : i32, i32, i32
  }
  func.func @transform_1(%arg0: i32, %arg1: i32) -> (i32, i32) {
    %c0_i32 = arith.constant 0 : i32
    %c0_i32_0 = arith.constant 0 : i32
    %c0_i32_1 = arith.constant 0 : i32
    return %c0_i32, %c0_i32_0 : i32, i32
  }
  func.func @transform_2(%arg0: i32, %arg1: i32) -> (i32, i32) {
    %c0_i32 = arith.constant 0 : i32
    %c0_i32_0 = arith.constant 0 : i32
    %c0_i32_1 = arith.constant 0 : i32
    return %c0_i32, %c0_i32_0 : i32, i32
  }
  func.func @transform_3(%arg0: i32, %arg1: i32) -> (i32, i32) {
    %c0_i32 = arith.constant 0 : i32
    %c0_i32_0 = arith.constant 0 : i32
    %c0_i32_1 = arith.constant 0 : i32
    return %c0_i32, %c0_i32_0 : i32, i32
  }
  func.func @transform_4(%arg0: i32, %arg1: i32) -> (i32, i32) {
    %c0_i32 = arith.constant 0 : i32
    %c0_i32_0 = arith.constant 0 : i32
    return %arg0, %c0_i32 : i32, i32
  }
  func.func @transform_5(%arg0: i32, %arg1: i32) -> (i32, i32) {
    %c0_i32 = arith.constant 0 : i32
    %c0_i32_0 = arith.constant 0 : i32
    return %arg0, %c0_i32 : i32, i32
  }
  func.func @transform_6(%arg0: i32, %arg1: i32) -> (i32, i32, i32) {
    %c0_i32 = arith.constant 0 : i32
    %c0_i32_0 = arith.constant 0 : i32
    return %arg1, %arg0, %c0_i32 : i32, i32, i32
  }
  func.func @transform_7(%arg0: i32, %arg1: i32) -> (i32, i32) {
    %c0_i32 = arith.constant 0 : i32
    %c0_i32_0 = arith.constant 0 : i32
    return %arg0, %c0_i32 : i32, i32
  }
  func.func @transform_8(%arg0: i32, %arg1: i32) -> (i32, i32) {
    %c0_i32 = arith.constant 0 : i32
    %c0_i32_0 = arith.constant 0 : i32
    return %arg0, %c0_i32 : i32, i32
  }
}

</mosaic_0001>

<bundles_post_ra>
// kernel: tpu_custom_call.1
= control target key start
LH: loop header
LB: loop body
LE: loop exit
PB: predicated region body
PF: predicated region fallthrough
CT: control target
= control target key end

     0   :  { %14 = vsyncpa [#allocation6], 0  ;;  %s3274_s0 = inlined_call_operand.hbm [shape: f32[8,8,16], index: 0, kind: input, shape index: {}]   ;;  %s3275_s1 = inlined_call_operand.hbm [shape: bf16[16,512], index: 1, kind: input, shape index: {}]   ;;  %s3276_s2 = inlined_call_operand.hbm [shape: bf16[128,512], index: 2, kind: input, shape index: {}]   ;;  %s3277_s3 = inlined_call_operand.hbm [shape: f32[1,512], index: 3, kind: input, shape index: {}]   ;;  %s3278_s4 = inlined_call_operand.hbm [shape: f32[8,128], index: 4, kind: input, shape index: {}]   ;;  %s3279_s5 = inlined_call_operand.vmem [shape: f32[8,128], index: 5, kind: input, shape index: {}]   ;;  %s3280_s6 = inlined_call_operand.hbm [shape: f32[8,8,128], index: 6, kind: output, shape index: {0}]   ;;  %s3281_s7 = inlined_call_operand.hbm [shape: f32[8,128], index: 7, kind: output, shape index: {1}]   ;;  %s3282_s8 = inlined_call_operand.hbm [shape: f32[8,128], index: 8, kind: output, shape index: {2}]  }
   0x1   :  { %15 = vsyncpa [#allocation9], 0 }
   0x2   :  { %16 = vsyncpa [#allocation12], 0 }
   0x3   :  { %17 = vsyncpa [#allocation7], 0 }
   0x4   :  { %18 = vsyncpa [#allocation16], 0  ;;  %s2545_s27 = smov [#allocation8]  }
   0x5   :  { %s36_s28 = sshll.u32 %s2545_s27, 4  ;;  %s37_s28 = int_to_ptr.vmem [resolvable:$true] %s36_s28 }
   0x6   :  { %s2383_s29 = scalar_lea.vmem %s37_s28, 512  ;;  %p2388_p1 = scmp.lt.s32.totalorder %s37_s28, %s37_s28 }
   0x7   :  { %p2384_p0 = scmp.ne.s32.totalorder %s37_s28, %s2383_s29  ;;  %p2389_p2 = scmp.lt.s32.totalorder %s2383_s29, %s2383_s29 }
   0x9   :  { %p2390_p3 = por %p2389_p2, %p2388_p1 }
   0xb   :  { %p2391_p4 = pnand %p2390_p3, %p2384_p0 }
   0xd   :  { %2394 = shalt.err (!%p2391_p4)
}
   0xe   :  { %s2546_s30 = smov 256   ;;  %s2547_s9 = smov 16  }
   0xf   :  { %42 = dma.hbm_to_vmem [thread:$0]  %s3275_s1, 512, %s37_s28, [#allocation9], %s2546_s30, %s2546_s30, %s2547_s9  }
  0x10   :  { %s2548_s12 = smov [#allocation11]   ;;  %s2549_s14 = smov [#allocation5]  }
  0x11   :  { %s61_s13 = sshll.u32 %s2548_s12, 4  ;;  %s24_s15 = sshll.u32 %s2549_s14, 4  ;;  %s62_s13 = int_to_ptr.vmem [resolvable:$true] %s61_s13  ;;  %s25_s15 = int_to_ptr.vmem [resolvable:$true] %s24_s15 }
  0x12   :  { %s2403_s16 = scalar_lea.vmem %s62_s13, 64  ;;  %p2408_p6 = scmp.lt.s32.totalorder %s62_s13, %s62_s13 }
  0x13   :  { %p2404_p5 = scmp.ne.s32.totalorder %s62_s13, %s2403_s16  ;;  %p2409_p7 = scmp.lt.s32.totalorder %s2403_s16, %s2403_s16 }
  0x15   :  { %p2410_p8 = por %p2409_p7, %p2408_p6 }
  0x17   :  { %p2411_p9 = pnand %p2410_p8, %p2404_p5 }
  0x19   :  { %2414 = shalt.err (!%p2411_p9)
}
  0x1a   :  { %64 = dma.hbm_to_vmem [thread:$0]  %s3277_s3, 64, %s62_s13, [#allocation12]  }
  0x1b   :  { %s2423_s19 = scalar_lea.vmem %s25_s15, 1024  ;;  %p2428_p11 = scmp.lt.s32.totalorder %s25_s15, %s25_s15 }
  0x1c   :  { %p2424_p10 = scmp.ne.s32.totalorder %s25_s15, %s2423_s19  ;;  %p2429_p12 = scmp.lt.s32.totalorder %s2423_s19, %s2423_s19 }
  0x1e   :  { %p2430_p13 = por %p2429_p12, %p2428_p11 }
  0x20   :  { %p2431_p0 = pnand %p2430_p13, %p2424_p10 }
  0x22   :  { %2434 = shalt.err (!%p2431_p0)
}
  0x23   :  { %s2550_s1 = smov 128   ;;  %s2551_s20 = smov 8  }
  0x24   :  { %30 = dma.hbm_to_vmem [thread:$0]  %s3274_s0, 1024, %s25_s15, [#allocation6], %s2550_s1, %s2550_s1, %s2551_s20  }
  0x25   :  { %s2552_s23 = smov [#allocation10]   ;;  %s2553_s3 = smov [#allocation13]  }
  0x26   :  { %s48_s24 = sshll.u32 %s2552_s23, 4  ;;  %s71_s25 = sshll.u32 %s2553_s3, 4  ;;  %s49_s24 = int_to_ptr.vmem [resolvable:$true] %s48_s24  ;;  %s72_s25 = int_to_ptr.vmem [resolvable:$true] %s71_s25 }
  0x27   :  { %s2443_s26 = scalar_lea.vmem %s49_s24, 4096  ;;  %p2448_p2 = scmp.lt.s32.totalorder %s49_s24, %s49_s24 }
  0x28   :  { %p2444_p1 = scmp.ne.s32.totalorder %s49_s24, %s2443_s26  ;;  %p2449_p3 = scmp.lt.s32.totalorder %s2443_s26, %s2443_s26 }
  0x2a   :  { %p2450_p4 = por %p2449_p3, %p2448_p2 }
  0x2c   :  { %p2451_p5 = pnand %p2450_p4, %p2444_p1 }
  0x2e   :  { %2454 = shalt.err (!%p2451_p5)
}
  0x2f   :  { %54 = dma.hbm_to_vmem [thread:$0]  %s3276_s2, 4096, %s49_s24, [#allocation9], %s2546_s30, %s2546_s30, %s2547_s9  }
  0x30   :  { %s2463_s0 = scalar_lea.vmem %s72_s25, 128  ;;  %p2468_p7 = scmp.lt.s32.totalorder %s72_s25, %s72_s25 }
  0x31   :  { %p2464_p6 = scmp.ne.s32.totalorder %s72_s25, %s2463_s0  ;;  %p2469_p8 = scmp.lt.s32.totalorder %s2463_s0, %s2463_s0 }
  0x33   :  { %p2470_p9 = por %p2469_p8, %p2468_p7 }
  0x35   :  { %p2471_p10 = pnand %p2470_p9, %p2464_p6 }
  0x37   :  { %2474 = shalt.err (!%p2471_p10)
}
  0x38   :  { %74 = dma.hbm_to_vmem [thread:$0]  %s3278_s4, 128, %s72_s25, [#allocation12]  }
  0x39   :  { %2535 = dma.done.wait [#allocation6], 1024  }
  0x3a   :  { %2536 = vsyncadd [#allocation6], 4294966272 }
  0x3b   :  { %2537 = dma.done.wait [#allocation9], 4608  }
  0x3c   :  { %2538 = vsyncadd [#allocation9], 4294962688 }
  0x3d   :  { %2539 = dma.done.wait [#allocation12], 192  }
  0x3e   :  { %2540 = vsyncadd [#allocation12], 4294967104  ;;  %v3283_v0 = vmov 0   ;;  %v2629_v1 = vld [vmem:[#allocation8 + $0x4] ss:$16 sps:$4 sm:$0xff]   ;;  %vm181_vm0 = vcmask 130048   ;;  %v141_v55 = vlaneseq }
  0x3f   :  { %217 = vmatprep.mubr.bf16.mxu0 %v3283_v0  ;;  %258 = vmatprep.mubr.bf16.mxu1 %v3283_v0  ;;  %v2631_v2 = vld [vmem:[#allocation8 + $0xc] ss:$16 sps:$4 sm:$0xff]   ;;  %v2634_v3 = vld [vmem:[#allocation8] ss:$16 sps:$4 sm:$0xff]   ;;  %v2636_v4 = vld [vmem:[#allocation8 + $0x8] ss:$16 sps:$4 sm:$0xff]  }
  0x40   :  { %199 = vmatprep.subr.bf16.mxu0 %v2629_v1  ;;  %v138_v5 = vld [vmem:[#allocation5] sm:$0xff]  ;;  %240 = vmatprep.subr.bf16.mxu1 %v2631_v2  ;;  %v272_v7 = vld [vmem:[#allocation5 + $0x8] sm:$0xff]  ;;  %v365_v9 = vld [vmem:[#allocation5 + $0x10] sm:$0xff]  ;;  %v142_v56 = vshrl.u32 %v141_v55, 7  ;;  %s2556_s9 = smov [#allocation14]   ;;  %s2557_s12 = smov [#allocation17]  }
  0x41   :  { %v139_v6 = vpack.c.bf16 %v138_v5, %v138_v5  ;;  %200 = vmatpush1.bf16.msra.mxu0 %v2634_v3  ;;  %241 = vmatpush1.bf16.msra.mxu1 %v2636_v4  ;;  %v273_v8 = vpack.c.bf16 %v272_v7, %v272_v7  ;;  %v366_v10 = vpack.c.bf16 %v365_v9, %v365_v9  ;;  %v458_v11 = vld [vmem:[#allocation5 + $0x18] sm:$0xff]  ;;  %v551_v13 = vld [vmem:[#allocation5 + $0x20] sm:$0xff]  ;;  %v644_v15 = vld [vmem:[#allocation5 + $0x28] sm:$0xff]  ;;  %s2031_s11 = sshll.u32 %s2556_s9, 4  ;;  %s2054_s13 = sshll.u32 %s2557_s12, 4  ;;  %s2032_s11 = int_to_ptr.vmem [resolvable:$true] %s2031_s11  ;;  %s2055_s13 = int_to_ptr.vmem [resolvable:$true] %s2054_s13 }
  0x42   :  { %291 = vmatprep.subr.bf16.mxu0 %v2629_v1  ;;  %332 = vmatprep.subr.bf16.mxu1 %v2631_v2  ;;  %v459_v12 = vpack.c.bf16 %v458_v11, %v458_v11  ;;  %v552_v14 = vpack.c.bf16 %v551_v13, %v551_v13  ;;  %v645_v16 = vpack.c.bf16 %v644_v15, %v644_v15  ;;  %v737_v17 = vld [vmem:[#allocation5 + $0x30] sm:$0xff]  ;;  %v2693_v20 = vld [vmem:[#allocation10 + $0xec] ss:$16 sps:$4 sm:$0xff]   ;;  %v2705_v24 = vld [vmem:[#allocation10 + $0xe8] ss:$16 sps:$4 sm:$0xff]   ;;  %v143_v61 = vsub.s32 0, %v142_v56 }
  0x43   :  { %v738_v18 = vpack.c.bf16 %v737_v17, %v737_v17  ;;  %v2691_v19 = vld [vmem:[#allocation10 + $0xe4] ss:$16 sps:$4 sm:$0xff]   ;;  %v830_v21 = vld [vmem:[#allocation5 + $0x38] sm:$0xff]  ;;  %v2703_v23 = vld [vmem:[#allocation10 + $0xe0] ss:$16 sps:$4 sm:$0xff]   ;;  %v151_v62 = vsub.s32 2, %v142_v56 }
  0x44   :  { %2076 = vmatmul.mubr.msk.bf16.vlgmr.msra.gmra.mxu0 %vm181_vm0, %v139_v6  ;;  %2077 = vmatmul.mubr.msk.bf16.vlgmr.msra.gmra.mxu1 %vm181_vm0, %v139_v6  ;;  %v831_v22 = vpack.c.bf16 %v830_v21, %v830_v21  ;;  %v2707_v25 = vld [vmem:[#allocation10 + $0xc4] ss:$16 sps:$4 sm:$0xff]   ;;  %v2709_v26 = vld [vmem:[#allocation10 + $0xcc] ss:$16 sps:$4 sm:$0xff]   ;;  %v2715_v27 = vld [vmem:[#allocation10 + $0xc0] ss:$16 sps:$4 sm:$0xff]  }
  0x45   :  { %292 = vmatpush1.bf16.msra.mxu0 %v2634_v3  ;;  %333 = vmatpush1.bf16.msra.mxu1 %v2636_v4  ;;  %v2717_v28 = vld [vmem:[#allocation10 + $0xc8] ss:$16 sps:$4 sm:$0xff]   ;;  %v2721_v29 = vld [vmem:[#allocation10 + $0xa4] ss:$16 sps:$4 sm:$0xff]   ;;  %v2723_v30 = vld [vmem:[#allocation10 + $0xac] ss:$16 sps:$4 sm:$0xff]  }
  0x46   :  { %309 = vmatprep.mubr.bf16.mxu0 %v3283_v0  ;;  %350 = vmatprep.mubr.bf16.mxu1 %v3283_v0  ;;  %v2729_v31 = vld [vmem:[#allocation10 + $0xa0] ss:$16 sps:$4 sm:$0xff]   ;;  %v2731_v32 = vld [vmem:[#allocation10 + $0xa8] ss:$16 sps:$4 sm:$0xff]   ;;  %v2735_v33 = vld [vmem:[#allocation10 + $0x84] ss:$16 sps:$4 sm:$0xff]  }
  0x47   :  { %384 = vmatprep.subr.bf16.mxu0 %v2629_v1  ;;  %425 = vmatprep.subr.bf16.mxu1 %v2631_v2  ;;  %v2737_v34 = vld [vmem:[#allocation10 + $0x8c] ss:$16 sps:$4 sm:$0xff]   ;;  %v2741_v35 = vld [vmem:[#allocation10 + $0x80] ss:$16 sps:$4 sm:$0xff]   ;;  %v2743_v36 = vld [vmem:[#allocation10 + $0x88] ss:$16 sps:$4 sm:$0xff]  }
  0x48   :  { %v2747_v37 = vld [vmem:[#allocation10 + $0x64] ss:$16 sps:$4 sm:$0xff]   ;;  %v2749_v38 = vld [vmem:[#allocation10 + $0x6c] ss:$16 sps:$4 sm:$0xff]   ;;  %v2753_v39 = vld [vmem:[#allocation10 + $0x60] ss:$16 sps:$4 sm:$0xff]  }
  0x49   :  { %v2755_v40 = vld [vmem:[#allocation10 + $0x68] ss:$16 sps:$4 sm:$0xff]   ;;  %v2759_v41 = vld [vmem:[#allocation10 + $0x44] ss:$16 sps:$4 sm:$0xff]   ;;  %v2761_v42 = vld [vmem:[#allocation10 + $0x4c] ss:$16 sps:$4 sm:$0xff]  }
  0x4a   :  { %v2765_v43 = vld [vmem:[#allocation10 + $0x40] ss:$16 sps:$4 sm:$0xff]   ;;  %v2767_v44 = vld [vmem:[#allocation10 + $0x48] ss:$16 sps:$4 sm:$0xff]   ;;  %v2771_v45 = vld [vmem:[#allocation10 + $0x24] ss:$16 sps:$4 sm:$0xff]  }
  0x4b   :  { %v2773_v46 = vld [vmem:[#allocation10 + $0x2c] ss:$16 sps:$4 sm:$0xff]   ;;  %v2777_v47 = vld [vmem:[#allocation10 + $0x20] ss:$16 sps:$4 sm:$0xff]   ;;  %v2779_v48 = vld [vmem:[#allocation10 + $0x28] ss:$16 sps:$4 sm:$0xff]  }
  0x4c   :  { %2078 = vmatmul.mubr.msk.bf16.vlgmr.msra.gmra.mxu0 %vm181_vm0, %v273_v8  ;;  %2079 = vmatmul.mubr.msk.bf16.vlgmr.msra.gmra.mxu1 %vm181_vm0, %v273_v8  ;;  %v2783_v49 = vld [vmem:[#allocation10 + $0x4] ss:$16 sps:$4 sm:$0xff]   ;;  %v2785_v50 = vld [vmem:[#allocation10 + $0xc] ss:$16 sps:$4 sm:$0xff]   ;;  %v2789_v51 = vld [vmem:[#allocation10] ss:$16 sps:$4 sm:$0xff]  }
  0x4d   :  { %385 = vmatpush1.bf16.msra.mxu0 %v2634_v3  ;;  %426 = vmatpush1.bf16.msra.mxu1 %v2636_v4  ;;  %v2791_v52 = vld [vmem:[#allocation10 + $0x8] ss:$16 sps:$4 sm:$0xff]   ;;  %v137_v63 = vld [vmem:[#allocation11] sm:$0xf] }
  0x4e   :  { %402 = vmatprep.mubr.bf16.mxu0 %v3283_v0  ;;  %443 = vmatprep.mubr.bf16.mxu1 %v3283_v0  ;;  %v97_v53 = vld [vmem:[#allocation13] sm:$0xff]  ;;  %v2841_v7 = vrot.slane %v137_v63, %v143_v61  ;;  %v2843_v8 = vrot.slane %v137_v63, %v151_v62 }
  0x4f   :  { %477 = vmatprep.subr.bf16.mxu0 %v2629_v1  ;;  %518 = vmatprep.subr.bf16.mxu1 %v2631_v2  ;;  %v928_v54 = vpack.c.bf16 %v97_v53, %v97_v53 }
  0x54   :  { %2080 = vmatmul.mubr.msk.bf16.vlgmr.msra.gmra.mxu0 %vm181_vm0, %v366_v10  ;;  %2081 = vmatmul.mubr.msk.bf16.vlgmr.msra.gmra.mxu1 %vm181_vm0, %v366_v10 }
  0x55   :  { %478 = vmatpush1.bf16.msra.mxu0 %v2634_v3  ;;  %519 = vmatpush1.bf16.msra.mxu1 %v2636_v4 }
  0x56   :  { %495 = vmatprep.mubr.bf16.mxu0 %v3283_v0  ;;  %536 = vmatprep.mubr.bf16.mxu1 %v3283_v0 }
  0x57   :  { %570 = vmatprep.subr.bf16.mxu0 %v2629_v1  ;;  %611 = vmatprep.subr.bf16.mxu1 %v2631_v2 }
  0x5c   :  { %2082 = vmatmul.mubr.msk.bf16.vlgmr.msra.gmra.mxu0 %vm181_vm0, %v459_v12  ;;  %2083 = vmatmul.mubr.msk.bf16.vlgmr.msra.gmra.mxu1 %vm181_vm0, %v459_v12 }
  0x5d   :  { %571 = vmatpush1.bf16.msra.mxu0 %v2634_v3  ;;  %612 = vmatpush1.bf16.msra.mxu1 %v2636_v4 }
  0x5e   :  { %588 = vmatprep.mubr.bf16.mxu0 %v3283_v0  ;;  %629 = vmatprep.mubr.bf16.mxu1 %v3283_v0 }
  0x5f   :  { %663 = vmatprep.subr.bf16.mxu0 %v2629_v1  ;;  %704 = vmatprep.subr.bf16.mxu1 %v2631_v2 }
  0x64   :  { %2084 = vmatmul.mubr.msk.bf16.vlgmr.msra.gmra.mxu0 %vm181_vm0, %v552_v14  ;;  %2085 = vmatmul.mubr.msk.bf16.vlgmr.msra.gmra.mxu1 %vm181_vm0, %v552_v14 }
  0x65   :  { %664 = vmatpush1.bf16.msra.mxu0 %v2634_v3  ;;  %705 = vmatpush1.bf16.msra.mxu1 %v2636_v4 }
  0x66   :  { %681 = vmatprep.mubr.bf16.mxu0 %v3283_v0  ;;  %722 = vmatprep.mubr.bf16.mxu1 %v3283_v0 }
  0x67   :  { %756 = vmatprep.subr.bf16.mxu0 %v2629_v1  ;;  %797 = vmatprep.subr.bf16.mxu1 %v2631_v2 }
  0x6c   :  { %2086 = vmatmul.mubr.msk.bf16.vlgmr.msra.gmra.mxu0 %vm181_vm0, %v645_v16  ;;  %2087 = vmatmul.mubr.msk.bf16.vlgmr.msra.gmra.mxu1 %vm181_vm0, %v645_v16 }
  0x6d   :  { %757 = vmatpush1.bf16.msra.mxu0 %v2634_v3  ;;  %798 = vmatpush1.bf16.msra.mxu1 %v2636_v4 }
  0x6e   :  { %774 = vmatprep.mubr.bf16.mxu0 %v3283_v0  ;;  %815 = vmatprep.mubr.bf16.mxu1 %v3283_v0 }
  0x6f   :  { %849 = vmatprep.subr.bf16.mxu0 %v2629_v1  ;;  %890 = vmatprep.subr.bf16.mxu1 %v2631_v2 }
  0x74   :  { %2088 = vmatmul.mubr.msk.bf16.vlgmr.msra.gmra.mxu0 %vm181_vm0, %v738_v18  ;;  %2089 = vmatmul.mubr.msk.bf16.vlgmr.msra.gmra.mxu1 %vm181_vm0, %v738_v18 }
  0x75   :  { %850 = vmatpush1.bf16.msra.mxu0 %v2634_v3  ;;  %891 = vmatpush1.bf16.msra.mxu1 %v2636_v4  ;;  %v147_v3 = vsub.s32 1, %v142_v56  ;;  %v155_v4 = vsub.s32 3, %v142_v56 }
  0x76   :  { %867 = vmatprep.mubr.bf16.mxu0 %v3283_v0  ;;  %908 = vmatprep.mubr.bf16.mxu1 %v3283_v0 }
  0x77   :  { %1089 = vmatprep.subr.bf16.mxu0 %v2691_v19  ;;  %1130 = vmatprep.subr.bf16.mxu1 %v2693_v20  ;;  %v2845_v11 = vrot.slane %v137_v63, %v147_v3  ;;  %v2850_v13 = vrot.slane %v137_v63, %v155_v4 }
  0x7c   :  { %2090 = vmatmul.mubr.msk.bf16.vlgmr.msra.gmra.mxu0 %vm181_vm0, %v831_v22  ;;  %2091 = vmatmul.mubr.msk.bf16.vlgmr.msra.gmra.mxu1 %vm181_vm0, %v831_v22 }
  0x7d   :  { %1090 = vmatpush1.bf16.msra.mxu0 %v2703_v23  ;;  %1131 = vmatpush1.bf16.msra.mxu1 %v2705_v24 }
  0x7e   :  { %1091 = vmatprep.subr.bf16.mxu0 %v2707_v25  ;;  %1132 = vmatprep.subr.bf16.mxu1 %v2709_v26 }
  0x7f   :  { %1121 = vmatprep.mubr.bf16.mxu0 %v3283_v0  ;;  %1162 = vmatprep.mubr.bf16.mxu1 %v3283_v0 }
  0x81   :  { %1092 = vmatpush1.bf16.msra.mxu0 %v2715_v27  ;;  %1133 = vmatpush1.bf16.msra.mxu1 %v2717_v28 }
  0x82   :  { %1093 = vmatprep.subr.bf16.mxu0 %v2721_v29  ;;  %1134 = vmatprep.subr.bf16.mxu1 %v2723_v30 }
  0x85   :  { %1094 = vmatpush1.bf16.msra.mxu0 %v2729_v31  ;;  %1135 = vmatpush1.bf16.msra.mxu1 %v2731_v32 }
  0x86   :  { %1095 = vmatprep.subr.bf16.mxu0 %v2735_v33  ;;  %1136 = vmatprep.subr.bf16.mxu1 %v2737_v34 }
  0x89   :  { %1096 = vmatpush1.bf16.msra.mxu0 %v2741_v35  ;;  %1137 = vmatpush1.bf16.msra.mxu1 %v2743_v36 }
  0x8a   :  { %1097 = vmatprep.subr.bf16.mxu0 %v2747_v37  ;;  %1138 = vmatprep.subr.bf16.mxu1 %v2749_v38 }
  0x8d   :  { %1098 = vmatpush1.bf16.msra.mxu0 %v2753_v39  ;;  %1139 = vmatpush1.bf16.msra.mxu1 %v2755_v40 }
  0x8e   :  { %1099 = vmatprep.subr.bf16.mxu0 %v2759_v41  ;;  %1140 = vmatprep.subr.bf16.mxu1 %v2761_v42 }
  0x91   :  { %1100 = vmatpush1.bf16.msra.mxu0 %v2765_v43  ;;  %1141 = vmatpush1.bf16.msra.mxu1 %v2767_v44 }
  0x92   :  { %1101 = vmatprep.subr.bf16.mxu0 %v2771_v45  ;;  %1142 = vmatprep.subr.bf16.mxu1 %v2773_v46 }
  0x95   :  { %1102 = vmatpush1.bf16.msra.mxu0 %v2777_v47  ;;  %1143 = vmatpush1.bf16.msra.mxu1 %v2779_v48 }
  0x96   :  { %1103 = vmatprep.subr.bf16.mxu0 %v2783_v49  ;;  %1144 = vmatprep.subr.bf16.mxu1 %v2785_v50 }
  0x99   :  { %1104 = vmatpush1.bf16.msra.mxu0 %v2789_v51  ;;  %1145 = vmatpush1.bf16.msra.mxu1 %v2791_v52 }
  0x9a   :  { %1205 = vmatprep.subr.bf16.mxu0 %v2691_v19  ;;  %1246 = vmatprep.subr.bf16.mxu1 %v2693_v20 }
  0x9c   :  { %1122 = vmatmul.mubr.bf16.vlgmr.msra.gmra.mxu0 %v928_v54  ;;  %1163 = vmatmul.mubr.bf16.vlgmr.msra.gmra.mxu1 %v928_v54 }
  0x9d   :  { %1206 = vmatpush1.bf16.msra.mxu0 %v2703_v23  ;;  %1247 = vmatpush1.bf16.msra.mxu1 %v2705_v24 }
  0x9e   :  { %1207 = vmatprep.subr.bf16.mxu0 %v2707_v25  ;;  %1248 = vmatprep.subr.bf16.mxu1 %v2709_v26 }
  0x9f   :  { %1237 = vmatprep.mubr.bf16.mxu0 %v3283_v0  ;;  %1278 = vmatprep.mubr.bf16.mxu1 %v3283_v0 }
  0xa1   :  { %1208 = vmatpush1.bf16.msra.mxu0 %v2715_v27  ;;  %1249 = vmatpush1.bf16.msra.mxu1 %v2717_v28 }
  0xa2   :  { %1209 = vmatprep.subr.bf16.mxu0 %v2721_v29  ;;  %1250 = vmatprep.subr.bf16.mxu1 %v2723_v30 }
  0xa5   :  { %1210 = vmatpush1.bf16.msra.mxu0 %v2729_v31  ;;  %1251 = vmatpush1.bf16.msra.mxu1 %v2731_v32 }
  0xa6   :  { %1211 = vmatprep.subr.bf16.mxu0 %v2735_v33  ;;  %1252 = vmatprep.subr.bf16.mxu1 %v2737_v34 }
  0xa9   :  { %1212 = vmatpush1.bf16.msra.mxu0 %v2741_v35  ;;  %1253 = vmatpush1.bf16.msra.mxu1 %v2743_v36 }
  0xaa   :  { %1213 = vmatprep.subr.bf16.mxu0 %v2747_v37  ;;  %1254 = vmatprep.subr.bf16.mxu1 %v2749_v38 }
  0xad   :  { %1214 = vmatpush1.bf16.msra.mxu0 %v2753_v39  ;;  %1255 = vmatpush1.bf16.msra.mxu1 %v2755_v40 }
  0xae   :  { %1215 = vmatprep.subr.bf16.mxu0 %v2759_v41  ;;  %1256 = vmatprep.subr.bf16.mxu1 %v2761_v42 }
  0xb1   :  { %1216 = vmatpush1.bf16.msra.mxu0 %v2765_v43  ;;  %1257 = vmatpush1.bf16.msra.mxu1 %v2767_v44 }
  0xb2   :  { %1217 = vmatprep.subr.bf16.mxu0 %v2771_v45  ;;  %1258 = vmatprep.subr.bf16.mxu1 %v2773_v46 }
  0xb5   :  { %1218 = vmatpush1.bf16.msra.mxu0 %v2777_v47  ;;  %1259 = vmatpush1.bf16.msra.mxu1 %v2779_v48 }
  0xb6   :  { %1219 = vmatprep.subr.bf16.mxu0 %v2783_v49  ;;  %1260 = vmatprep.subr.bf16.mxu1 %v2785_v50 }
  0xb9   :  { %1220 = vmatpush1.bf16.msra.mxu0 %v2789_v51  ;;  %1261 = vmatpush1.bf16.msra.mxu1 %v2791_v52 }
  0xba   :  { %1322 = vmatprep.subr.bf16.mxu0 %v2691_v19  ;;  %1363 = vmatprep.subr.bf16.mxu1 %v2693_v20 }
 0x104   :  { %v2833_v57 = vpop.f32.mrf.mxu0  ;;  %v2835_v58 = vpop.f32.mrf.mxu1 }
 0x106   :  { %v2837_v59 = vpop.f32.mrf.mxu0  ;;  %v2839_v60 = vpop.f32.mrf.mxu1 }
 0x108   :  { %v223_v1 = vpop.f32.mrf.mxu0  ;;  %v264_v2 = vpop.f32.mrf.mxu1 }
 0x10a   :  { %v224_v5 = vpop.f32.mrf.mxu0  ;;  %v265_v6 = vpop.f32.mrf.mxu1 }
 0x10c   :  { %v311_v9 = vpop.f32.mrf.mxu0  ;;  %v352_v10 = vpop.f32.mrf.mxu1 }
 0x10d   :  { %v2848_v12 = vadd.f32 %v311_v9, %v2841_v7  ;;  %v2853_v14 = vadd.f32 %v352_v10, %v2843_v8 }
 0x10e   :  { %v313_v15 = vpop.f32.mrf.mxu0  ;;  %v354_v16 = vpop.f32.mrf.mxu1 }
 0x10f   :  { %v2856_v17 = vadd.f32 %v313_v15, %v2845_v11  ;;  %v2859_v18 = vadd.f32 %v354_v16, %v2850_v13 }
 0x110   :  { %v315_v21 = vpop.f32.mrf.mxu0  ;;  %v356_v22 = vpop.f32.mrf.mxu1 }
 0x112   :  { %v316_v53 = vpop.f32.mrf.mxu0  ;;  %v357_v54 = vpop.f32.mrf.mxu1 }
 0x114   :  { %v404_v55 = vpop.f32.mrf.mxu0  ;;  %v445_v56 = vpop.f32.mrf.mxu1 }
 0x115   :  { %v2862_v61 = vadd.f32 %v404_v55, %v2841_v7  ;;  %v2865_v62 = vadd.f32 %v445_v56, %v2843_v8 }
 0x116   :  { %v406_v63 = vpop.f32.mrf.mxu0  ;;  %v447_v1 = vpop.f32.mrf.mxu1 }
 0x117   :  { %v2868_v2 = vadd.f32 %v406_v63, %v2845_v11  ;;  %v2871_v3 = vadd.f32 %v447_v1, %v2850_v13 }
 0x118   :  { %v408_v4 = vpop.f32.mrf.mxu0  ;;  %v449_v5 = vpop.f32.mrf.mxu1 }
 0x11a   :  { %v409_v6 = vpop.f32.mrf.mxu0  ;;  %v450_v9 = vpop.f32.mrf.mxu1 }
 0x11c   :  { %v497_v10 = vpop.f32.mrf.mxu0  ;;  %v538_v15 = vpop.f32.mrf.mxu1 }
 0x11d   :  { %v2874_v16 = vadd.f32 %v497_v10, %v2841_v7  ;;  %v2877_v21 = vadd.f32 %v538_v15, %v2843_v8 }
 0x11e   :  { %v499_v22 = vpop.f32.mrf.mxu0  ;;  %v540_v53 = vpop.f32.mrf.mxu1 }
 0x11f   :  { %3285 = vst [vmem:[#allocation23_spill] sm:$0xff] %v2874_v16  ;;  %3286 = vst [vmem:[#allocation24_spill] sm:$0xff] %v2877_v21  ;;  %v2880_v54 = vadd.f32 %v499_v22, %v2845_v11  ;;  %v2883_v55 = vadd.f32 %v540_v53, %v2850_v13 }
 0x120   :  { %v501_v56 = vpop.f32.mrf.mxu0  ;;  %v542_v63 = vpop.f32.mrf.mxu1 }
 0x121   :  { %3287 = vst [vmem:[#allocation25_spill] sm:$0xff] %v2880_v54  ;;  %3288 = vst [vmem:[#allocation26_spill] sm:$0xff] %v2883_v55 }
 0x122   :  { %v502_v1 = vpop.f32.mrf.mxu0  ;;  %v543_v4 = vpop.f32.mrf.mxu1 }
 0x124   :  { %v590_v5 = vpop.f32.mrf.mxu0  ;;  %v631_v6 = vpop.f32.mrf.mxu1 }
 0x125   :  { %v2886_v9 = vadd.f32 %v590_v5, %v2841_v7  ;;  %v2889_v10 = vadd.f32 %v631_v6, %v2843_v8 }
 0x126   :  { %v592_v15 = vpop.f32.mrf.mxu0  ;;  %v633_v0 = vpop.f32.mrf.mxu1 }
 0x127   :  { %3289 = vst [vmem:[#allocation27_spill] sm:$0xff] %v2886_v9  ;;  %3290 = vst [vmem:[#allocation28_spill] sm:$0xff] %v2889_v10  ;;  %v2892_v22 = vadd.f32 %v592_v15, %v2845_v11  ;;  %v2895_v53 = vadd.f32 %v633_v0, %v2850_v13 }
 0x128   :  { %v594_v56 = vpop.f32.mrf.mxu0  ;;  %v635_v63 = vpop.f32.mrf.mxu1 }
 0x129   :  { %3291 = vst [vmem:[#allocation29_spill] sm:$0xff] %v2892_v22  ;;  %3292 = vst [vmem:[#allocation30_spill] sm:$0xff] %v2895_v53 }
 0x12a   :  { %v595_v1 = vpop.f32.mrf.mxu0  ;;  %v636_v4 = vpop.f32.mrf.mxu1 }
 0x12c   :  { %v683_v55 = vpop.f32.mrf.mxu0  ;;  %v724_v21 = vpop.f32.mrf.mxu1 }
 0x12d   :  { %v2898_v5 = vadd.f32 %v683_v55, %v2841_v7  ;;  %v2901_v6 = vadd.f32 %v724_v21, %v2843_v8 }
 0x12e   :  { %v685_v10 = vpop.f32.mrf.mxu0  ;;  %v726_v9 = vpop.f32.mrf.mxu1 }
 0x12f   :  { %3293 = vst [vmem:[#allocation31_spill] sm:$0xff] %v2898_v5  ;;  %3294 = vst [vmem:[#allocation32_spill] sm:$0xff] %v2901_v6  ;;  %v2904_v15 = vadd.f32 %v685_v10, %v2845_v11  ;;  %v2907_v0 = vadd.f32 %v726_v9, %v2850_v13 }
 0x130   :  { %v687_v56 = vpop.f32.mrf.mxu0  ;;  %v728_v63 = vpop.f32.mrf.mxu1 }
 0x131   :  { %3295 = vst [vmem:[#allocation33_spill] sm:$0xff] %v2904_v15  ;;  %3296 = vst [vmem:[#allocation34_spill] sm:$0xff] %v2907_v0 }
 0x132   :  { %v688_v1 = vpop.f32.mrf.mxu0  ;;  %v729_v4 = vpop.f32.mrf.mxu1 }
 0x134   :  { %v776_v53 = vpop.f32.mrf.mxu0  ;;  %v817_v22 = vpop.f32.mrf.mxu1 }
 0x135   :  { %v2910_v55 = vadd.f32 %v776_v53, %v2841_v7  ;;  %v2913_v21 = vadd.f32 %v817_v22, %v2843_v8 }
 0x136   :  { %v778_v6 = vpop.f32.mrf.mxu0  ;;  %v819_v5 = vpop.f32.mrf.mxu1 }
 0x137   :  { %3297 = vst [vmem:[#allocation35_spill] sm:$0xff] %v2910_v55  ;;  %3298 = vst [vmem:[#allocation36_spill] sm:$0xff] %v2913_v21  ;;  %v2916_v10 = vadd.f32 %v778_v6, %v2845_v11  ;;  %v2919_v9 = vadd.f32 %v819_v5, %v2850_v13 }
 0x138   :  { %v780_v56 = vpop.f32.mrf.mxu0  ;;  %v821_v63 = vpop.f32.mrf.mxu1 }
 0x139   :  { %3299 = vst [vmem:[#allocation37_spill] sm:$0xff] %v2916_v10  ;;  %3300 = vst [vmem:[#allocation38_spill] sm:$0xff] %v2919_v9  ;;  %v220_v9 = vadd.f32 %v2833_v57, %v2841_v7  ;;  %v261_v57 = vadd.f32 %v2835_v58, %v2843_v8  ;;  %v99_v58 = vld [vmem:[%s3279_s5] sm:$0xff]  ;;  %s2555_s5 = smov [#allocation15]  }
 0x13a   :  { %v781_v1 = vpop.f32.mrf.mxu0  ;;  %v822_v4 = vpop.f32.mrf.mxu1  ;;  %s2044_s30 = sshll.u32 %s2555_s5, 4  ;;  %s2045_s30 = int_to_ptr.vmem [resolvable:$true] %s2044_s30 }
 0x13b   :  { %s2475_s14 = scalar_lea.vmem %s2045_s30, 128  ;;  %p2480_p12 = scmp.lt.s32.totalorder %s2045_s30, %s2045_s30 }
 0x13c   :  { %v869_v0 = vpop.f32.mrf.mxu0  ;;  %v910_v15 = vpop.f32.mrf.mxu1  ;;  %p2476_p11 = scmp.ne.s32.totalorder %s2045_s30, %s2475_s14  ;;  %p2481_p13 = scmp.lt.s32.totalorder %s2475_s14, %s2475_s14 }
 0x13d   :  { %v2922_v53 = vadd.f32 %v869_v0, %v2841_v7  ;;  %v2925_v22 = vadd.f32 %v910_v15, %v2843_v8  ;;  %v222_v15 = vadd.f32 %v2837_v59, %v2845_v11 }
 0x13e   :  { %v871_v21 = vpop.f32.mrf.mxu0  ;;  %v912_v55 = vpop.f32.mrf.mxu1  ;;  %p2482_p0 = por %p2481_p13, %p2480_p12 }
 0x13f   :  { %3301 = vst [vmem:[#allocation39_spill] sm:$0xff] %v2922_v53  ;;  %3302 = vst [vmem:[#allocation40_spill] sm:$0xff] %v2925_v22  ;;  %v2928_v6 = vadd.f32 %v871_v21, %v2845_v11  ;;  %v2931_v5 = vadd.f32 %v912_v55, %v2850_v13 }
 0x140   :  { %v873_v56 = vpop.f32.mrf.mxu0  ;;  %v914_v63 = vpop.f32.mrf.mxu1  ;;  %p2483_p1 = pnand %p2482_p0, %p2476_p11 }
 0x141   :  { %3303 = vst [vmem:[#allocation41_spill] sm:$0xff] %v2928_v6 }
 0x142   :  { %v874_v1 = vpop.f32.mrf.mxu0  ;;  %v915_v4 = vpop.f32.mrf.mxu1 }
 0x143   :  { %v263_v4 = vadd.f32 %v2839_v60, %v2850_v13 }
 0x15c   :  { %v1123_v0 = vpop.f32.mrf.mxu0  ;;  %v1164_v53 = vpop.f32.mrf.mxu1 }
 0x15d   :  { %v1171_v22 = vadd.f32 %v1123_v0, %v220_v9  ;;  %v1173_v7 = vadd.f32 %v1164_v53, %v261_v57 }
 0x15e   :  { %v1125_v10 = vpop.f32.mrf.mxu0  ;;  %v1166_v54 = vpop.f32.mrf.mxu1 }
 0x15f   :  { %v2124_v21 = vmul.f32 -1.442695, %v1171_v22  ;;  %v1172_v6 = vadd.f32 %v1125_v10, %v222_v15  ;;  %v2126_v59 = vmul.f32 -1.442695, %v1173_v7  ;;  %v1174_v11 = vadd.f32 %v1166_v54, %v263_v4 }
 0x160   :  { %v1127_v16 = vpop.f32.mrf.mxu0  ;;  %v1168_v55 = vpop.f32.mrf.mxu1 }
 0x161   :  { %2215 = vpow2.f32 %v2124_v21  ;;  %v2125_v56 = vmul.f32 -1.442695, %v1172_v6 }
 0x162   :  { %v1128_v63 = vpop.f32.mrf.mxu0  ;;  %v1169_v1 = vpop.f32.mrf.mxu1 }
 0x163   :  { %2217 = vpow2.f32 %v2125_v56  ;;  %v3304_v1 = vmov 0  }
 0x164   :  { %2219 = vpow2.f32 %v2126_v59 }
 0x165   :  { %2221 = vtanh.f32 %v1174_v11 }
 0x16e   :  { %v2216_v9 = vpop.eup %2215 }
 0x16f   :  { %v1184_v0 = vadd.f32 1.0, %v2216_v9 }
 0x170   :  { %v2218_v10 = vpop.eup %2217 }
 0x171   :  { %2223 = vrcp.f32 %v1184_v0  ;;  %v1185_v16 = vadd.f32 1.0, %v2218_v10  ;;  %v2220_v22 = vpop.eup %2219 }
 0x172   :  { %v2222_v6 = vpop.eup %2221  ;;  %v1186_v60 = vadd.f32 1.0, %v2220_v22 }
 0x173   :  { %2225 = vrcp.f32 %v1185_v16 }
 0x174   :  { %2227 = vrcp.f32 %v1186_v60 }
 0x17e   :  { %v2224_v15 = vpop.eup %2223 }
 0x17f   :  { %v1195_v8 = vmul.f32 %v2224_v15, %v2222_v6 }
 0x180   :  { %v2226_v53 = vpop.eup %2225 }
 0x181   :  { %v1194_v13 = vmul.f32 %v2226_v53, %v99_v58  ;;  %v2228_v21 = vpop.eup %2227 }
 0x183   :  { %v2944_v54 = vadd.f32 %v1195_v8, %v1194_v13 }
 0x185   :  { %2229 = vtanh.f32 %v2944_v54 }
 0x192   :  { %v2230_v55 = vpop.eup %2229 }
 0x193   :  { %v1198_v56 = vmul.f32 %v2230_v55, %v2228_v21 }
 0x195   :  { %1199 = vst [vmem:[#allocation14] sm:$0xff] %v1198_v56  ;;  %v1204_v63 = vpack.c.bf16 %v1198_v56, %v1198_v56 }
 0x197   :  { %1238 = vmatmul.mubr.bf16.vlgmr.msra.gmra.mxu0 %v1204_v63  ;;  %1279 = vmatmul.mubr.bf16.vlgmr.msra.gmra.mxu1 %v1204_v63 }
 0x198   :  { %1323 = vmatpush1.bf16.msra.mxu0 %v2703_v23  ;;  %1364 = vmatpush1.bf16.msra.mxu1 %v2705_v24 }
 0x199   :  { %1324 = vmatprep.subr.bf16.mxu0 %v2707_v25  ;;  %1365 = vmatprep.subr.bf16.mxu1 %v2709_v26 }
 0x19a   :  { %1354 = vmatprep.mubr.bf16.mxu0 %v3304_v1  ;;  %1395 = vmatprep.mubr.bf16.mxu1 %v3304_v1 }
 0x19c   :  { %1325 = vmatpush1.bf16.msra.mxu0 %v2715_v27  ;;  %1366 = vmatpush1.bf16.msra.mxu1 %v2717_v28 }
 0x19d   :  { %1326 = vmatprep.subr.bf16.mxu0 %v2721_v29  ;;  %1367 = vmatprep.subr.bf16.mxu1 %v2723_v30 }
 0x1a0   :  { %1327 = vmatpush1.bf16.msra.mxu0 %v2729_v31  ;;  %1368 = vmatpush1.bf16.msra.mxu1 %v2731_v32 }
 0x1a1   :  { %1328 = vmatprep.subr.bf16.mxu0 %v2735_v33  ;;  %1369 = vmatprep.subr.bf16.mxu1 %v2737_v34 }
 0x1a4   :  { %1329 = vmatpush1.bf16.msra.mxu0 %v2741_v35  ;;  %1370 = vmatpush1.bf16.msra.mxu1 %v2743_v36 }
 0x1a5   :  { %1330 = vmatprep.subr.bf16.mxu0 %v2747_v37  ;;  %1371 = vmatprep.subr.bf16.mxu1 %v2749_v38 }
 0x1a8   :  { %1331 = vmatpush1.bf16.msra.mxu0 %v2753_v39  ;;  %1372 = vmatpush1.bf16.msra.mxu1 %v2755_v40 }
 0x1a9   :  { %1332 = vmatprep.subr.bf16.mxu0 %v2759_v41  ;;  %1373 = vmatprep.subr.bf16.mxu1 %v2761_v42 }
 0x1ac   :  { %1333 = vmatpush1.bf16.msra.mxu0 %v2765_v43  ;;  %1374 = vmatpush1.bf16.msra.mxu1 %v2767_v44 }
 0x1ad   :  { %1334 = vmatprep.subr.bf16.mxu0 %v2771_v45  ;;  %1375 = vmatprep.subr.bf16.mxu1 %v2773_v46 }
 0x1b0   :  { %1335 = vmatpush1.bf16.msra.mxu0 %v2777_v47  ;;  %1376 = vmatpush1.bf16.msra.mxu1 %v2779_v48 }
 0x1b1   :  { %1336 = vmatprep.subr.bf16.mxu0 %v2783_v49  ;;  %1377 = vmatprep.subr.bf16.mxu1 %v2785_v50 }
 0x1b4   :  { %1337 = vmatpush1.bf16.msra.mxu0 %v2789_v51  ;;  %1378 = vmatpush1.bf16.msra.mxu1 %v2791_v52 }
 0x1b5   :  { %1439 = vmatprep.subr.bf16.mxu0 %v2691_v19  ;;  %1480 = vmatprep.subr.bf16.mxu1 %v2693_v20 }
 0x257   :  { %v1239_v57 = vpop.f32.mrf.mxu0  ;;  %v1280_v7 = vpop.f32.mrf.mxu1 }
 0x258   :  { %v1287_v4 = vadd.f32 %v1239_v57, %v2848_v12  ;;  %v1289_v58 = vadd.f32 %v1280_v7, %v2853_v14 }
 0x259   :  { %v1241_v59 = vpop.f32.mrf.mxu0  ;;  %v1282_v11 = vpop.f32.mrf.mxu1 }
 0x25a   :  { %v2127_v9 = vmul.f32 -1.442695, %v1287_v4  ;;  %v1288_v0 = vadd.f32 %v1241_v59, %v2856_v17  ;;  %v2129_v8 = vmul.f32 -1.442695, %v1289_v58  ;;  %v1290_v53 = vadd.f32 %v1282_v11, %v2859_v18 }
 0x25b   :  { %v1243_v10 = vpop.f32.mrf.mxu0  ;;  %v1284_v16 = vpop.f32.mrf.mxu1 }
 0x25c   :  { %2231 = vpow2.f32 %v2127_v9  ;;  %v2128_v22 = vmul.f32 -1.442695, %v1288_v0 }
 0x25d   :  { %v1244_v6 = vpop.f32.mrf.mxu0  ;;  %v1285_v15 = vpop.f32.mrf.mxu1 }
 0x25e   :  { %2233 = vpow2.f32 %v2128_v22 }
 0x25f   :  { %2235 = vpow2.f32 %v2129_v8 }
 0x260   :  { %2237 = vtanh.f32 %v1290_v53 }
 0x269   :  { %v2232_v60 = vpop.eup %2231 }
 0x26a   :  { %v1300_v13 = vadd.f32 1.0, %v2232_v60 }
 0x26b   :  { %v2234_v12 = vpop.eup %2233 }
 0x26c   :  { %2239 = vrcp.f32 %v1300_v13  ;;  %v1301_v21 = vadd.f32 1.0, %v2234_v12  ;;  %v2236_v17 = vpop.eup %2235 }
 0x26d   :  { %v2238_v55 = vpop.eup %2237  ;;  %v1302_v4 = vadd.f32 1.0, %v2236_v17 }
 0x26e   :  { %2241 = vrcp.f32 %v1301_v21 }
 0x26f   :  { %2243 = vrcp.f32 %v1302_v4 }
 0x279   :  { %v2240_v56 = vpop.eup %2239 }
 0x27a   :  { %v1311_v63 = vmul.f32 %v2240_v56, %v2238_v55 }
 0x27b   :  { %v2242_v57 = vpop.eup %2241 }
 0x27c   :  { %v1310_v59 = vmul.f32 %v2242_v57, %v2944_v54  ;;  %v2244_v18 = vpop.eup %2243 }
 0x27e   :  { %v2986_v14 = vadd.f32 %v1311_v63, %v1310_v59 }
 0x280   :  { %2245 = vtanh.f32 %v2986_v14 }
 0x28d   :  { %v2246_v7 = vpop.eup %2245 }
 0x28e   :  { %v1314_v11 = vmul.f32 %v2246_v7, %v2244_v18 }
 0x290   :  { %1316 = vst [vmem:[#allocation14 + $0x8] sm:$0xff] %v1314_v11  ;;  %v1321_v9 = vpack.c.bf16 %v1314_v11, %v1314_v11 }
 0x292   :  { %1355 = vmatmul.mubr.bf16.vlgmr.msra.gmra.mxu0 %v1321_v9  ;;  %1396 = vmatmul.mubr.bf16.vlgmr.msra.gmra.mxu1 %v1321_v9 }
 0x293   :  { %1440 = vmatpush1.bf16.msra.mxu0 %v2703_v23  ;;  %1481 = vmatpush1.bf16.msra.mxu1 %v2705_v24 }
 0x294   :  { %1441 = vmatprep.subr.bf16.mxu0 %v2707_v25  ;;  %1482 = vmatprep.subr.bf16.mxu1 %v2709_v26 }
 0x295   :  { %1471 = vmatprep.mubr.bf16.mxu0 %v3304_v1  ;;  %1512 = vmatprep.mubr.bf16.mxu1 %v3304_v1 }
 0x297   :  { %1442 = vmatpush1.bf16.msra.mxu0 %v2715_v27  ;;  %1483 = vmatpush1.bf16.msra.mxu1 %v2717_v28 }
 0x298   :  { %1443 = vmatprep.subr.bf16.mxu0 %v2721_v29  ;;  %1484 = vmatprep.subr.bf16.mxu1 %v2723_v30 }
 0x29b   :  { %1444 = vmatpush1.bf16.msra.mxu0 %v2729_v31  ;;  %1485 = vmatpush1.bf16.msra.mxu1 %v2731_v32 }
 0x29c   :  { %1445 = vmatprep.subr.bf16.mxu0 %v2735_v33  ;;  %1486 = vmatprep.subr.bf16.mxu1 %v2737_v34 }
 0x29f   :  { %1446 = vmatpush1.bf16.msra.mxu0 %v2741_v35  ;;  %1487 = vmatpush1.bf16.msra.mxu1 %v2743_v36 }
 0x2a0   :  { %1447 = vmatprep.subr.bf16.mxu0 %v2747_v37  ;;  %1488 = vmatprep.subr.bf16.mxu1 %v2749_v38 }
 0x2a3   :  { %1448 = vmatpush1.bf16.msra.mxu0 %v2753_v39  ;;  %1489 = vmatpush1.bf16.msra.mxu1 %v2755_v40 }
 0x2a4   :  { %1449 = vmatprep.subr.bf16.mxu0 %v2759_v41  ;;  %1490 = vmatprep.subr.bf16.mxu1 %v2761_v42 }
 0x2a7   :  { %1450 = vmatpush1.bf16.msra.mxu0 %v2765_v43  ;;  %1491 = vmatpush1.bf16.msra.mxu1 %v2767_v44 }
 0x2a8   :  { %1451 = vmatprep.subr.bf16.mxu0 %v2771_v45  ;;  %1492 = vmatprep.subr.bf16.mxu1 %v2773_v46 }
 0x2ab   :  { %1452 = vmatpush1.bf16.msra.mxu0 %v2777_v47  ;;  %1493 = vmatpush1.bf16.msra.mxu1 %v2779_v48 }
 0x2ac   :  { %1453 = vmatprep.subr.bf16.mxu0 %v2783_v49  ;;  %1494 = vmatprep.subr.bf16.mxu1 %v2785_v50 }
 0x2af   :  { %1454 = vmatpush1.bf16.msra.mxu0 %v2789_v51  ;;  %1495 = vmatpush1.bf16.msra.mxu1 %v2791_v52 }
 0x2b0   :  { %1556 = vmatprep.subr.bf16.mxu0 %v2691_v19  ;;  %1597 = vmatprep.subr.bf16.mxu1 %v2693_v20 }
 0x352   :  { %v1356_v54 = vpop.f32.mrf.mxu0  ;;  %v1397_v0 = vpop.f32.mrf.mxu1 }
 0x353   :  { %v1404_v10 = vadd.f32 %v1356_v54, %v2862_v61  ;;  %v1406_v12 = vadd.f32 %v1397_v0, %v2865_v62 }
 0x354   :  { %v1358_v16 = vpop.f32.mrf.mxu0  ;;  %v1399_v22 = vpop.f32.mrf.mxu1 }
 0x355   :  { %v2130_v6 = vmul.f32 -1.442695, %v1404_v10  ;;  %v1405_v15 = vadd.f32 %v1358_v16, %v2868_v2  ;;  %v2132_v21 = vmul.f32 -1.442695, %v1406_v12  ;;  %v1407_v17 = vadd.f32 %v1399_v22, %v2871_v3  ;;  %v3305_v16 = vld [vmem:[#allocation23_spill] sm:$0xff] }
 0x356   :  { %v1360_v58 = vpop.f32.mrf.mxu0  ;;  %v1401_v8 = vpop.f32.mrf.mxu1 }
 0x357   :  { %2247 = vpow2.f32 %v2130_v6  ;;  %v2131_v53 = vmul.f32 -1.442695, %v1405_v15  ;;  %v3306_v8 = vld [vmem:[#allocation25_spill] sm:$0xff] }
 0x358   :  { %v1361_v60 = vpop.f32.mrf.mxu0  ;;  %v1402_v13 = vpop.f32.mrf.mxu1 }
 0x359   :  { %2249 = vpow2.f32 %v2131_v53 }
 0x35a   :  { %2251 = vpow2.f32 %v2132_v21 }
 0x35b   :  { %2253 = vtanh.f32 %v1407_v17 }
 0x364   :  { %v2248_v55 = vpop.eup %2247 }
 0x365   :  { %v1417_v56 = vadd.f32 1.0, %v2248_v55  ;;  %v3307_v55 = vld [vmem:[#allocation24_spill] sm:$0xff] }
 0x366   :  { %v2250_v61 = vpop.eup %2249 }
 0x367   :  { %2255 = vrcp.f32 %v1417_v56  ;;  %v1418_v63 = vadd.f32 1.0, %v2250_v61  ;;  %v2252_v2 = vpop.eup %2251 }
 0x368   :  { %v2254_v57 = vpop.eup %2253  ;;  %v1419_v7 = vadd.f32 1.0, %v2252_v2 }
 0x369   :  { %2257 = vrcp.f32 %v1418_v63 }
 0x36a   :  { %2259 = vrcp.f32 %v1419_v7 }
 0x374   :  { %v2256_v4 = vpop.eup %2255 }
 0x375   :  { %v1428_v59 = vmul.f32 %v2256_v4, %v2254_v57 }
 0x376   :  { %v2258_v18 = vpop.eup %2257 }
 0x377   :  { %v1427_v11 = vmul.f32 %v2258_v18, %v2986_v14  ;;  %v2260_v3 = vpop.eup %2259 }
 0x379   :  { %v3028_v62 = vadd.f32 %v1428_v59, %v1427_v11 }
 0x37b   :  { %2261 = vtanh.f32 %v3028_v62 }
 0x388   :  { %v2262_v9 = vpop.eup %2261 }
 0x389   :  { %v1431_v54 = vmul.f32 %v2262_v9, %v2260_v3 }
 0x38b   :  { %1433 = vst [vmem:[#allocation14 + $0x10] sm:$0xff] %v1431_v54  ;;  %v1438_v0 = vpack.c.bf16 %v1431_v54, %v1431_v54 }
 0x38d   :  { %1472 = vmatmul.mubr.bf16.vlgmr.msra.gmra.mxu0 %v1438_v0  ;;  %1513 = vmatmul.mubr.bf16.vlgmr.msra.gmra.mxu1 %v1438_v0 }
 0x38e   :  { %1557 = vmatpush1.bf16.msra.mxu0 %v2703_v23  ;;  %1598 = vmatpush1.bf16.msra.mxu1 %v2705_v24 }
 0x38f   :  { %1558 = vmatprep.subr.bf16.mxu0 %v2707_v25  ;;  %1599 = vmatprep.subr.bf16.mxu1 %v2709_v26 }
 0x390   :  { %1588 = vmatprep.mubr.bf16.mxu0 %v3304_v1  ;;  %1629 = vmatprep.mubr.bf16.mxu1 %v3304_v1 }
 0x392   :  { %1559 = vmatpush1.bf16.msra.mxu0 %v2715_v27  ;;  %1600 = vmatpush1.bf16.msra.mxu1 %v2717_v28 }
 0x393   :  { %1560 = vmatprep.subr.bf16.mxu0 %v2721_v29  ;;  %1601 = vmatprep.subr.bf16.mxu1 %v2723_v30 }
 0x396   :  { %1561 = vmatpush1.bf16.msra.mxu0 %v2729_v31  ;;  %1602 = vmatpush1.bf16.msra.mxu1 %v2731_v32 }
 0x397   :  { %1562 = vmatprep.subr.bf16.mxu0 %v2735_v33  ;;  %1603 = vmatprep.subr.bf16.mxu1 %v2737_v34 }
 0x39a   :  { %1563 = vmatpush1.bf16.msra.mxu0 %v2741_v35  ;;  %1604 = vmatpush1.bf16.msra.mxu1 %v2743_v36 }
 0x39b   :  { %1564 = vmatprep.subr.bf16.mxu0 %v2747_v37  ;;  %1605 = vmatprep.subr.bf16.mxu1 %v2749_v38 }
 0x39e   :  { %1565 = vmatpush1.bf16.msra.mxu0 %v2753_v39  ;;  %1606 = vmatpush1.bf16.msra.mxu1 %v2755_v40 }
 0x39f   :  { %1566 = vmatprep.subr.bf16.mxu0 %v2759_v41  ;;  %1607 = vmatprep.subr.bf16.mxu1 %v2761_v42 }
 0x3a2   :  { %1567 = vmatpush1.bf16.msra.mxu0 %v2765_v43  ;;  %1608 = vmatpush1.bf16.msra.mxu1 %v2767_v44 }
 0x3a3   :  { %1568 = vmatprep.subr.bf16.mxu0 %v2771_v45  ;;  %1609 = vmatprep.subr.bf16.mxu1 %v2773_v46 }
 0x3a6   :  { %1569 = vmatpush1.bf16.msra.mxu0 %v2777_v47  ;;  %1610 = vmatpush1.bf16.msra.mxu1 %v2779_v48 }
 0x3a7   :  { %1570 = vmatprep.subr.bf16.mxu0 %v2783_v49  ;;  %1611 = vmatprep.subr.bf16.mxu1 %v2785_v50 }
 0x3aa   :  { %1571 = vmatpush1.bf16.msra.mxu0 %v2789_v51  ;;  %1612 = vmatpush1.bf16.msra.mxu1 %v2791_v52 }
 0x3ab   :  { %1673 = vmatprep.subr.bf16.mxu0 %v2691_v19  ;;  %1714 = vmatprep.subr.bf16.mxu1 %v2693_v20  ;;  %v3308_v20 = vld [vmem:[#allocation26_spill] sm:$0xff] }
 0x44d   :  { %v1473_v14 = vpop.f32.mrf.mxu0  ;;  %v1514_v10 = vpop.f32.mrf.mxu1 }
 0x44e   :  { %v1521_v22 = vadd.f32 %v1473_v14, %v3305_v16  ;;  %v1523_v19 = vadd.f32 %v1514_v10, %v3307_v55  ;;  %v3133_v55 = vld [vmem:[#allocation10 + $0xc0] ss:$16 sps:$4 sm:$0xff]  }
 0x44f   :  { %v1475_v6 = vpop.f32.mrf.mxu0  ;;  %v1516_v15 = vpop.f32.mrf.mxu1 }
 0x450   :  { %v2133_v58 = vmul.f32 -1.442695, %v1521_v22  ;;  %v1522_v53 = vadd.f32 %v1475_v6, %v3306_v8  ;;  %v2135_v56 = vmul.f32 -1.442695, %v1523_v19  ;;  %v1524_v61 = vadd.f32 %v1516_v15, %v3308_v20  ;;  %v3136_v19 = vld [vmem:[#allocation10 + $0xc8] ss:$16 sps:$4 sm:$0xff]  }
 0x451   :  { %v1477_v60 = vpop.f32.mrf.mxu0  ;;  %v1518_v13 = vpop.f32.mrf.mxu1  ;;  %v3142_v20 = vld [vmem:[#allocation10 + $0xac] ss:$16 sps:$4 sm:$0xff]  }
 0x452   :  { %2263 = vpow2.f32 %v2133_v58  ;;  %v2134_v12 = vmul.f32 -1.442695, %v1522_v53  ;;  %v3119_v13 = vld [vmem:[#allocation10 + $0xe0] ss:$16 sps:$4 sm:$0xff]  }
 0x453   :  { %v1478_v21 = vpop.f32.mrf.mxu0  ;;  %v1519_v17 = vpop.f32.mrf.mxu1 }
 0x454   :  { %2265 = vpow2.f32 %v2134_v12  ;;  %v3122_v12 = vld [vmem:[#allocation10 + $0xe8] ss:$16 sps:$4 sm:$0xff]   ;;  %v3125_v21 = vld [vmem:[#allocation10 + $0xc4] ss:$16 sps:$4 sm:$0xff]   ;;  %v3128_v17 = vld [vmem:[#allocation10 + $0xcc] ss:$16 sps:$4 sm:$0xff]  }
 0x455   :  { %2267 = vpow2.f32 %v2135_v56  ;;  %v3139_v56 = vld [vmem:[#allocation10 + $0xa4] ss:$16 sps:$4 sm:$0xff]  }
 0x456   :  { %2269 = vtanh.f32 %v1524_v61  ;;  %v3145_v61 = vld [vmem:[#allocation10 + $0xa0] ss:$16 sps:$4 sm:$0xff]  }
 0x45f   :  { %v2264_v63 = vpop.eup %2263 }
 0x460   :  { %v1534_v2 = vadd.f32 1.0, %v2264_v63  ;;  %v3148_v63 = vld [vmem:[#allocation10 + $0xa8] ss:$16 sps:$4 sm:$0xff]  }
 0x461   :  { %v2266_v57 = vpop.eup %2265 }
 0x462   :  { %2271 = vrcp.f32 %v1534_v2  ;;  %v1535_v4 = vadd.f32 1.0, %v2266_v57  ;;  %v2268_v59 = vpop.eup %2267  ;;  %v3151_v2 = vld [vmem:[#allocation10 + $0x84] ss:$16 sps:$4 sm:$0xff]   ;;  %v3154_v57 = vld [vmem:[#allocation10 + $0x8c] ss:$16 sps:$4 sm:$0xff]  }
 0x463   :  { %v2270_v18 = vpop.eup %2269  ;;  %v1536_v9 = vadd.f32 1.0, %v2268_v59  ;;  %v3160_v59 = vld [vmem:[#allocation10 + $0x88] ss:$16 sps:$4 sm:$0xff]  }
 0x464   :  { %2273 = vrcp.f32 %v1535_v4  ;;  %v3157_v4 = vld [vmem:[#allocation10 + $0x80] ss:$16 sps:$4 sm:$0xff]  }
 0x465   :  { %2275 = vrcp.f32 %v1536_v9  ;;  %v3175_v9 = vld [vmem:[#allocation10 + $0x44] ss:$16 sps:$4 sm:$0xff]  }
 0x46f   :  { %v2272_v7 = vpop.eup %2271 }
 0x470   :  { %v1545_v11 = vmul.f32 %v2272_v7, %v2270_v18  ;;  %v3163_v18 = vld [vmem:[#allocation10 + $0x64] ss:$16 sps:$4 sm:$0xff]   ;;  %v3166_v7 = vld [vmem:[#allocation10 + $0x6c] ss:$16 sps:$4 sm:$0xff]  }
 0x471   :  { %v2274_v3 = vpop.eup %2273 }
 0x472   :  { %v1544_v54 = vmul.f32 %v2274_v3, %v3028_v62  ;;  %v2276_v14 = vpop.eup %2275  ;;  %v3172_v3 = vld [vmem:[#allocation10 + $0x68] ss:$16 sps:$4 sm:$0xff]  }
 0x474   :  { %v3070_v0 = vadd.f32 %v1545_v11, %v1544_v54  ;;  %v3169_v11 = vld [vmem:[#allocation10 + $0x60] ss:$16 sps:$4 sm:$0xff]   ;;  %v3178_v54 = vld [vmem:[#allocation10 + $0x4c] ss:$16 sps:$4 sm:$0xff]  }
 0x476   :  { %2277 = vtanh.f32 %v3070_v0 }
 0x483   :  { %v2278_v10 = vpop.eup %2277 }
 0x484   :  { %v1548_v16 = vmul.f32 %v2278_v10, %v2276_v14  ;;  %v3184_v14 = vld [vmem:[#allocation10 + $0x48] ss:$16 sps:$4 sm:$0xff]   ;;  %v3187_v10 = vld [vmem:[#allocation10 + $0x24] ss:$16 sps:$4 sm:$0xff]  }
 0x486   :  { %1550 = vst [vmem:[#allocation14 + $0x18] sm:$0xff] %v1548_v16  ;;  %v1555_v22 = vpack.c.bf16 %v1548_v16, %v1548_v16  ;;  %v3190_v16 = vld [vmem:[#allocation10 + $0x2c] ss:$16 sps:$4 sm:$0xff]  }
 0x488   :  { %1589 = vmatmul.mubr.bf16.vlgmr.msra.gmra.mxu0 %v1555_v22  ;;  %1630 = vmatmul.mubr.bf16.vlgmr.msra.gmra.mxu1 %v1555_v22  ;;  %v3193_v22 = vld [vmem:[#allocation10 + $0x20] ss:$16 sps:$4 sm:$0xff]  }
 0x489   :  { %1674 = vmatpush1.bf16.msra.mxu0 %v2703_v23  ;;  %1715 = vmatpush1.bf16.msra.mxu1 %v2705_v24  ;;  %v3105_v23 = vld [vmem:[#allocation10 + $0xe4] ss:$16 sps:$4 sm:$0xff]   ;;  %v3108_v24 = vld [vmem:[#allocation10 + $0xec] ss:$16 sps:$4 sm:$0xff]  }
 0x48a   :  { %1675 = vmatprep.subr.bf16.mxu0 %v2707_v25  ;;  %1716 = vmatprep.subr.bf16.mxu1 %v2709_v26 }
 0x48b   :  { %1705 = vmatprep.mubr.bf16.mxu0 %v3304_v1  ;;  %1746 = vmatprep.mubr.bf16.mxu1 %v3304_v1 }
 0x48d   :  { %1676 = vmatpush1.bf16.msra.mxu0 %v2715_v27  ;;  %1717 = vmatpush1.bf16.msra.mxu1 %v2717_v28  ;;  %v3309_v27 = vld [vmem:[#allocation27_spill] sm:$0xff] }
 0x48e   :  { %1677 = vmatprep.subr.bf16.mxu0 %v2721_v29  ;;  %1718 = vmatprep.subr.bf16.mxu1 %v2723_v30 }
 0x491   :  { %1678 = vmatpush1.bf16.msra.mxu0 %v2729_v31  ;;  %1719 = vmatpush1.bf16.msra.mxu1 %v2731_v32  ;;  %v3310_v32 = vld [vmem:[#allocation29_spill] sm:$0xff] }
 0x492   :  { %1679 = vmatprep.subr.bf16.mxu0 %v2735_v33  ;;  %1720 = vmatprep.subr.bf16.mxu1 %v2737_v34 }
 0x495   :  { %1680 = vmatpush1.bf16.msra.mxu0 %v2741_v35  ;;  %1721 = vmatpush1.bf16.msra.mxu1 %v2743_v36 }
 0x496   :  { %1681 = vmatprep.subr.bf16.mxu0 %v2747_v37  ;;  %1722 = vmatprep.subr.bf16.mxu1 %v2749_v38 }
 0x499   :  { %1682 = vmatpush1.bf16.msra.mxu0 %v2753_v39  ;;  %1723 = vmatpush1.bf16.msra.mxu1 %v2755_v40  ;;  %v3311_v39 = vld [vmem:[#allocation28_spill] sm:$0xff] }
 0x49a   :  { %1683 = vmatprep.subr.bf16.mxu0 %v2759_v41  ;;  %1724 = vmatprep.subr.bf16.mxu1 %v2761_v42  ;;  %v3312_v42 = vld [vmem:[#allocation30_spill] sm:$0xff] }
 0x49d   :  { %1684 = vmatpush1.bf16.msra.mxu0 %v2765_v43  ;;  %1725 = vmatpush1.bf16.msra.mxu1 %v2767_v44 }
 0x49e   :  { %1685 = vmatprep.subr.bf16.mxu0 %v2771_v45  ;;  %1726 = vmatprep.subr.bf16.mxu1 %v2773_v46 }
 0x4a1   :  { %1686 = vmatpush1.bf16.msra.mxu0 %v2777_v47  ;;  %1727 = vmatpush1.bf16.msra.mxu1 %v2779_v48 }
 0x4a2   :  { %1687 = vmatprep.subr.bf16.mxu0 %v2783_v49  ;;  %1728 = vmatprep.subr.bf16.mxu1 %v2785_v50 }
 0x4a5   :  { %1688 = vmatpush1.bf16.msra.mxu0 %v2789_v51  ;;  %1729 = vmatpush1.bf16.msra.mxu1 %v2791_v52 }
 0x4a6   :  { %1790 = vmatprep.subr.bf16.mxu0 %v3105_v23  ;;  %1831 = vmatprep.subr.bf16.mxu1 %v3108_v24 }
 0x548   :  { %v1590_v25 = vpop.f32.mrf.mxu0  ;;  %v1631_v26 = vpop.f32.mrf.mxu1 }
 0x549   :  { %v1638_v28 = vadd.f32 %v1590_v25, %v3309_v27  ;;  %v1640_v40 = vadd.f32 %v1631_v26, %v3311_v39  ;;  %v3196_v25 = vld [vmem:[#allocation10 + $0x28] ss:$16 sps:$4 sm:$0xff]   ;;  %v3199_v26 = vld [vmem:[#allocation10 + $0x4] ss:$16 sps:$4 sm:$0xff]   ;;  %v3202_v27 = vld [vmem:[#allocation10 + $0xc] ss:$16 sps:$4 sm:$0xff]  }
 0x54a   :  { %v1592_v29 = vpop.f32.mrf.mxu0  ;;  %v1633_v30 = vpop.f32.mrf.mxu1 }
 0x54b   :  { %v2136_v31 = vmul.f32 -1.442695, %v1638_v28  ;;  %v1639_v33 = vadd.f32 %v1592_v29, %v3310_v32  ;;  %v2138_v41 = vmul.f32 -1.442695, %v1640_v40  ;;  %v1641_v43 = vadd.f32 %v1633_v30, %v3312_v42  ;;  %v3205_v28 = vld [vmem:[#allocation10] ss:$16 sps:$4 sm:$0xff]  }
 0x54c   :  { %v1594_v34 = vpop.f32.mrf.mxu0  ;;  %v1635_v35 = vpop.f32.mrf.mxu1  ;;  %v3208_v29 = vld [vmem:[#allocation10 + $0x8] ss:$16 sps:$4 sm:$0xff]   ;;  %v3313_v32 = vld [vmem:[#allocation31_spill] sm:$0xff] }
 0x54d   :  { %2279 = vpow2.f32 %v2136_v31  ;;  %v2137_v36 = vmul.f32 -1.442695, %v1639_v33 }
 0x54e   :  { %v1595_v37 = vpop.f32.mrf.mxu0  ;;  %v1636_v38 = vpop.f32.mrf.mxu1 }
 0x54f   :  { %2281 = vpow2.f32 %v2137_v36  ;;  %v3314_v37 = vld [vmem:[#allocation33_spill] sm:$0xff] }
 0x550   :  { %2283 = vpow2.f32 %v2138_v41 }
 0x551   :  { %2285 = vtanh.f32 %v1641_v43 }
 0x55a   :  { %v2280_v44 = vpop.eup %2279 }
 0x55b   :  { %v1651_v45 = vadd.f32 1.0, %v2280_v44  ;;  %v3315_v44 = vld [vmem:[#allocation32_spill] sm:$0xff] }
 0x55c   :  { %v2282_v46 = vpop.eup %2281 }
 0x55d   :  { %2287 = vrcp.f32 %v1651_v45  ;;  %v1652_v47 = vadd.f32 1.0, %v2282_v46  ;;  %v2284_v48 = vpop.eup %2283 }
 0x55e   :  { %v2286_v49 = vpop.eup %2285  ;;  %v1653_v62 = vadd.f32 1.0, %v2284_v48 }
 0x55f   :  { %2289 = vrcp.f32 %v1652_v47 }
 0x560   :  { %2291 = vrcp.f32 %v1653_v62 }
 0x56a   :  { %v2288_v50 = vpop.eup %2287 }
 0x56b   :  { %v1662_v51 = vmul.f32 %v2288_v50, %v2286_v49 }
 0x56c   :  { %v2290_v52 = vpop.eup %2289 }
 0x56d   :  { %v1661_v6 = vmul.f32 %v2290_v52, %v3070_v0  ;;  %v2292_v58 = vpop.eup %2291  ;;  %v3181_v0 = vld [vmem:[#allocation10 + $0x40] ss:$16 sps:$4 sm:$0xff]  }
 0x56f   :  { %v3116_v15 = vadd.f32 %v1662_v51, %v1661_v6 }
 0x571   :  { %2293 = vtanh.f32 %v3116_v15 }
 0x57e   :  { %v2294_v8 = vpop.eup %2293 }
 0x57f   :  { %v1665_v53 = vmul.f32 %v2294_v8, %v2292_v58 }
 0x581   :  { %1667 = vst [vmem:[#allocation14 + $0x20] sm:$0xff] %v1665_v53  ;;  %v1672_v60 = vpack.c.bf16 %v1665_v53, %v1665_v53 }
 0x583   :  { %1706 = vmatmul.mubr.bf16.vlgmr.msra.gmra.mxu0 %v1672_v60  ;;  %1747 = vmatmul.mubr.bf16.vlgmr.msra.gmra.mxu1 %v1672_v60 }
 0x584   :  { %1791 = vmatpush1.bf16.msra.mxu0 %v3119_v13  ;;  %1832 = vmatpush1.bf16.msra.mxu1 %v3122_v12 }
 0x585   :  { %1792 = vmatprep.subr.bf16.mxu0 %v3125_v21  ;;  %1833 = vmatprep.subr.bf16.mxu1 %v3128_v17 }
 0x586   :  { %1822 = vmatprep.mubr.bf16.mxu0 %v3304_v1  ;;  %1863 = vmatprep.mubr.bf16.mxu1 %v3304_v1 }
 0x588   :  { %1793 = vmatpush1.bf16.msra.mxu0 %v3133_v55  ;;  %1834 = vmatpush1.bf16.msra.mxu1 %v3136_v19 }
 0x589   :  { %1794 = vmatprep.subr.bf16.mxu0 %v3139_v56  ;;  %1835 = vmatprep.subr.bf16.mxu1 %v3142_v20 }
 0x58c   :  { %1795 = vmatpush1.bf16.msra.mxu0 %v3145_v61  ;;  %1836 = vmatpush1.bf16.msra.mxu1 %v3148_v63 }
 0x58d   :  { %1796 = vmatprep.subr.bf16.mxu0 %v3151_v2  ;;  %1837 = vmatprep.subr.bf16.mxu1 %v3154_v57 }
 0x590   :  { %1797 = vmatpush1.bf16.msra.mxu0 %v3157_v4  ;;  %1838 = vmatpush1.bf16.msra.mxu1 %v3160_v59 }
 0x591   :  { %1798 = vmatprep.subr.bf16.mxu0 %v3163_v18  ;;  %1839 = vmatprep.subr.bf16.mxu1 %v3166_v7 }
 0x594   :  { %1799 = vmatpush1.bf16.msra.mxu0 %v3169_v11  ;;  %1840 = vmatpush1.bf16.msra.mxu1 %v3172_v3 }
 0x595   :  { %1800 = vmatprep.subr.bf16.mxu0 %v3175_v9  ;;  %1841 = vmatprep.subr.bf16.mxu1 %v3178_v54 }
 0x598   :  { %1801 = vmatpush1.bf16.msra.mxu0 %v3181_v0  ;;  %1842 = vmatpush1.bf16.msra.mxu1 %v3184_v14 }
 0x599   :  { %1802 = vmatprep.subr.bf16.mxu0 %v3187_v10  ;;  %1843 = vmatprep.subr.bf16.mxu1 %v3190_v16 }
 0x59c   :  { %1803 = vmatpush1.bf16.msra.mxu0 %v3193_v22  ;;  %1844 = vmatpush1.bf16.msra.mxu1 %v3196_v25 }
 0x59d   :  { %1804 = vmatprep.subr.bf16.mxu0 %v3199_v26  ;;  %1845 = vmatprep.subr.bf16.mxu1 %v3202_v27 }
 0x5a0   :  { %1805 = vmatpush1.bf16.msra.mxu0 %v3205_v28  ;;  %1846 = vmatpush1.bf16.msra.mxu1 %v3208_v29 }
 0x5a1   :  { %1907 = vmatprep.subr.bf16.mxu0 %v3105_v23  ;;  %1948 = vmatprep.subr.bf16.mxu1 %v3108_v24  ;;  %v3316_v24 = vld [vmem:[#allocation34_spill] sm:$0xff] }
 0x643   :  { %v1707_v30 = vpop.f32.mrf.mxu0  ;;  %v1748_v31 = vpop.f32.mrf.mxu1 }
 0x644   :  { %v1755_v33 = vadd.f32 %v1707_v30, %v3313_v32  ;;  %v1757_v23 = vadd.f32 %v1748_v31, %v3315_v44  ;;  %v3322_v44 = vld [vmem:[#allocation41_spill] sm:$0xff] }
 0x645   :  { %v1709_v34 = vpop.f32.mrf.mxu0  ;;  %v1750_v35 = vpop.f32.mrf.mxu1 }
 0x646   :  { %v2139_v36 = vmul.f32 -1.442695, %v1755_v33  ;;  %v1756_v38 = vadd.f32 %v1709_v34, %v3314_v37  ;;  %v2141_v45 = vmul.f32 -1.442695, %v1757_v23  ;;  %v1758_v46 = vadd.f32 %v1750_v35, %v3316_v24 }
 0x647   :  { %v1711_v39 = vpop.f32.mrf.mxu0  ;;  %v1752_v40 = vpop.f32.mrf.mxu1 }
 0x648   :  { %2295 = vpow2.f32 %v2139_v36  ;;  %v2140_v41 = vmul.f32 -1.442695, %v1756_v38  ;;  %v3321_v39 = vld [vmem:[#allocation39_spill] sm:$0xff] }
 0x649   :  { %v1712_v42 = vpop.f32.mrf.mxu0  ;;  %v1753_v43 = vpop.f32.mrf.mxu1 }
 0x64a   :  { %2297 = vpow2.f32 %v2140_v41 }
 0x64b   :  { %2299 = vpow2.f32 %v2141_v45 }
 0x64c   :  { %2301 = vtanh.f32 %v1758_v46 }
 0x655   :  { %v2296_v47 = vpop.eup %2295 }
 0x656   :  { %v1768_v48 = vadd.f32 1.0, %v2296_v47 }
 0x657   :  { %v2298_v49 = vpop.eup %2297 }
 0x658   :  { %2303 = vrcp.f32 %v1768_v48  ;;  %v1769_v50 = vadd.f32 1.0, %v2298_v49  ;;  %v2300_v51 = vpop.eup %2299  ;;  %v3323_v49 = vld [vmem:[#allocation40_spill] sm:$0xff] }
 0x659   :  { %v2302_v52 = vpop.eup %2301  ;;  %v1770_v8 = vadd.f32 1.0, %v2300_v51 }
 0x65a   :  { %2305 = vrcp.f32 %v1769_v50 }
 0x65b   :  { %2307 = vrcp.f32 %v1770_v8 }
 0x665   :  { %v2304_v62 = vpop.eup %2303 }
 0x666   :  { %v1779_v6 = vmul.f32 %v2304_v62, %v2302_v52 }
 0x667   :  { %v2306_v58 = vpop.eup %2305 }
 0x668   :  { %v1778_v53 = vmul.f32 %v2306_v58, %v3116_v15  ;;  %v2308_v30 = vpop.eup %2307 }
 0x66a   :  { %v3218_v60 = vadd.f32 %v1779_v6, %v1778_v53 }
 0x66c   :  { %2309 = vtanh.f32 %v3218_v60 }
 0x679   :  { %v2310_v31 = vpop.eup %2309 }
 0x67a   :  { %v1782_v32 = vmul.f32 %v2310_v31, %v2308_v30 }
 0x67c   :  { %1784 = vst [vmem:[#allocation14 + $0x28] sm:$0xff] %v1782_v32  ;;  %v1789_v33 = vpack.c.bf16 %v1782_v32, %v1782_v32 }
 0x67e   :  { %1823 = vmatmul.mubr.bf16.vlgmr.msra.gmra.mxu0 %v1789_v33  ;;  %1864 = vmatmul.mubr.bf16.vlgmr.msra.gmra.mxu1 %v1789_v33 }
 0x67f   :  { %1908 = vmatpush1.bf16.msra.mxu0 %v3119_v13  ;;  %1949 = vmatpush1.bf16.msra.mxu1 %v3122_v12  ;;  %v3317_v13 = vld [vmem:[#allocation35_spill] sm:$0xff] }
 0x680   :  { %1909 = vmatprep.subr.bf16.mxu0 %v3125_v21  ;;  %1950 = vmatprep.subr.bf16.mxu1 %v3128_v17 }
 0x681   :  { %1939 = vmatprep.mubr.bf16.mxu0 %v3304_v1  ;;  %1980 = vmatprep.mubr.bf16.mxu1 %v3304_v1 }
 0x683   :  { %1910 = vmatpush1.bf16.msra.mxu0 %v3133_v55  ;;  %1951 = vmatpush1.bf16.msra.mxu1 %v3136_v19  ;;  %v3318_v19 = vld [vmem:[#allocation37_spill] sm:$0xff] }
 0x684   :  { %1911 = vmatprep.subr.bf16.mxu0 %v3139_v56  ;;  %1952 = vmatprep.subr.bf16.mxu1 %v3142_v20 }
 0x687   :  { %1912 = vmatpush1.bf16.msra.mxu0 %v3145_v61  ;;  %1953 = vmatpush1.bf16.msra.mxu1 %v3148_v63 }
 0x688   :  { %1913 = vmatprep.subr.bf16.mxu0 %v3151_v2  ;;  %1954 = vmatprep.subr.bf16.mxu1 %v3154_v57 }
 0x68b   :  { %1914 = vmatpush1.bf16.msra.mxu0 %v3157_v4  ;;  %1955 = vmatpush1.bf16.msra.mxu1 %v3160_v59  ;;  %v3319_v4 = vld [vmem:[#allocation36_spill] sm:$0xff] }
 0x68c   :  { %1915 = vmatprep.subr.bf16.mxu0 %v3163_v18  ;;  %1956 = vmatprep.subr.bf16.mxu1 %v3166_v7  ;;  %v3320_v7 = vld [vmem:[#allocation38_spill] sm:$0xff] }
 0x68f   :  { %1916 = vmatpush1.bf16.msra.mxu0 %v3169_v11  ;;  %1957 = vmatpush1.bf16.msra.mxu1 %v3172_v3 }
 0x690   :  { %1917 = vmatprep.subr.bf16.mxu0 %v3175_v9  ;;  %1958 = vmatprep.subr.bf16.mxu1 %v3178_v54 }
 0x693   :  { %1918 = vmatpush1.bf16.msra.mxu0 %v3181_v0  ;;  %1959 = vmatpush1.bf16.msra.mxu1 %v3184_v14 }
 0x694   :  { %1919 = vmatprep.subr.bf16.mxu0 %v3187_v10  ;;  %1960 = vmatprep.subr.bf16.mxu1 %v3190_v16 }
 0x697   :  { %1920 = vmatpush1.bf16.msra.mxu0 %v3193_v22  ;;  %1961 = vmatpush1.bf16.msra.mxu1 %v3196_v25 }
 0x698   :  { %1921 = vmatprep.subr.bf16.mxu0 %v3199_v26  ;;  %1962 = vmatprep.subr.bf16.mxu1 %v3202_v27 }
 0x69b   :  { %1922 = vmatpush1.bf16.msra.mxu0 %v3205_v28  ;;  %1963 = vmatpush1.bf16.msra.mxu1 %v3208_v29 }
 0x73e   :  { %v1824_v1 = vpop.f32.mrf.mxu0  ;;  %v1865_v15 = vpop.f32.mrf.mxu1 }
 0x73f   :  { %v1872_v12 = vadd.f32 %v1824_v1, %v3317_v13  ;;  %v1874_v59 = vadd.f32 %v1865_v15, %v3319_v4 }
 0x740   :  { %v1826_v21 = vpop.f32.mrf.mxu0  ;;  %v1867_v17 = vpop.f32.mrf.mxu1 }
 0x741   :  { %v2142_v55 = vmul.f32 -1.442695, %v1872_v12  ;;  %v1873_v56 = vadd.f32 %v1826_v21, %v3318_v19  ;;  %v2144_v18 = vmul.f32 -1.442695, %v1874_v59  ;;  %v1875_v11 = vadd.f32 %v1867_v17, %v3320_v7 }
 0x742   :  { %v1828_v20 = vpop.f32.mrf.mxu0  ;;  %v1869_v61 = vpop.f32.mrf.mxu1 }
 0x743   :  { %2311 = vpow2.f32 %v2142_v55  ;;  %v2143_v63 = vmul.f32 -1.442695, %v1873_v56 }
 0x744   :  { %v1829_v2 = vpop.f32.mrf.mxu0  ;;  %v1870_v57 = vpop.f32.mrf.mxu1 }
 0x745   :  { %2313 = vpow2.f32 %v2143_v63 }
 0x746   :  { %2315 = vpow2.f32 %v2144_v18 }
 0x747   :  { %2317 = vtanh.f32 %v1875_v11 }
 0x750   :  { %v2312_v3 = vpop.eup %2311 }
 0x751   :  { %v1885_v9 = vadd.f32 1.0, %v2312_v3 }
 0x752   :  { %v2314_v54 = vpop.eup %2313 }
 0x753   :  { %2319 = vrcp.f32 %v1885_v9  ;;  %v1886_v0 = vadd.f32 1.0, %v2314_v54  ;;  %v2316_v14 = vpop.eup %2315 }
 0x754   :  { %v2318_v10 = vpop.eup %2317  ;;  %v1887_v26 = vadd.f32 1.0, %v2316_v14 }
 0x755   :  { %2321 = vrcp.f32 %v1886_v0 }
 0x756   :  { %2323 = vrcp.f32 %v1887_v26 }
 0x760   :  { %v2320_v16 = vpop.eup %2319 }
 0x761   :  { %v1896_v22 = vmul.f32 %v2320_v16, %v2318_v10 }
 0x762   :  { %v2322_v25 = vpop.eup %2321 }
 0x763   :  { %v1895_v27 = vmul.f32 %v2322_v25, %v3218_v60  ;;  %v2324_v29 = vpop.eup %2323 }
 0x765   :  { %v1897_v28 = vadd.f32 %v1896_v22, %v1895_v27 }
 0x767   :  { %2325 = vtanh.f32 %v1897_v28 }
 0x774   :  { %v2326_v34 = vpop.eup %2325 }
 0x775   :  { %v1899_v35 = vmul.f32 %v2326_v34, %v2324_v29 }
 0x777   :  { %1901 = vst [vmem:[#allocation14 + $0x30] sm:$0xff] %v1899_v35  ;;  %v1906_v36 = vpack.c.bf16 %v1899_v35, %v1899_v35 }
 0x779   :  { %1940 = vmatmul.mubr.bf16.vlgmr.msra.gmra.mxu0 %v1906_v36  ;;  %1981 = vmatmul.mubr.bf16.vlgmr.msra.gmra.mxu1 %v1906_v36 }
 0x839   :  { %v1941_v37 = vpop.f32.mrf.mxu0  ;;  %v1982_v38 = vpop.f32.mrf.mxu1 }
 0x83a   :  { %v1989_v40 = vadd.f32 %v1941_v37, %v3321_v39  ;;  %v1991_v50 = vadd.f32 %v1982_v38, %v3323_v49 }
 0x83b   :  { %v1943_v41 = vpop.f32.mrf.mxu0  ;;  %v1984_v42 = vpop.f32.mrf.mxu1 }
 0x83c   :  { %v2145_v43 = vmul.f32 -1.442695, %v1989_v40  ;;  %v1990_v23 = vadd.f32 %v1943_v41, %v3322_v44  ;;  %v2147_v51 = vmul.f32 -1.442695, %v1991_v50  ;;  %v1992_v52 = vadd.f32 %v1984_v42, %v2931_v5 }
 0x83d   :  { %v1945_v45 = vpop.f32.mrf.mxu0  ;;  %v1986_v24 = vpop.f32.mrf.mxu1 }
 0x83e   :  { %2327 = vpow2.f32 %v2145_v43  ;;  %v2146_v46 = vmul.f32 -1.442695, %v1990_v23 }
 0x83f   :  { %v1946_v47 = vpop.f32.mrf.mxu0  ;;  %v1987_v48 = vpop.f32.mrf.mxu1 }
 0x840   :  { %2329 = vpow2.f32 %v2146_v46 }
 0x841   :  { %2331 = vpow2.f32 %v2147_v51 }
 0x842   :  { %2333 = vtanh.f32 %v1992_v52 }
 0x84b   :  { %v2328_v62 = vpop.eup %2327 }
 0x84c   :  { %v2002_v6 = vadd.f32 1.0, %v2328_v62 }
 0x84d   :  { %v2330_v58 = vpop.eup %2329 }
 0x84e   :  { %2335 = vrcp.f32 %v2002_v6  ;;  %v2003_v8 = vadd.f32 1.0, %v2330_v58  ;;  %v2332_v53 = vpop.eup %2331 }
 0x84f   :  { %v2334_v60 = vpop.eup %2333  ;;  %v2004_v33 = vadd.f32 1.0, %v2332_v53 }
 0x850   :  { %2337 = vrcp.f32 %v2003_v8 }
 0x851   :  { %2339 = vrcp.f32 %v2004_v33 }
 0x85b   :  { %v2336_v30 = vpop.eup %2335 }
 0x85c   :  { %v2013_v31 = vmul.f32 %v2336_v30, %v2334_v60 }
 0x85d   :  { %v2338_v32 = vpop.eup %2337 }
 0x85e   :  { %v2012_v1 = vmul.f32 %v2338_v32, %v1897_v28  ;;  %v2340_v5 = vpop.eup %2339 }
 0x860   :  { %v2014_v15 = vadd.f32 %v2013_v31, %v2012_v1 }
 0x862   :  { %2025 = vst [vmem:[#allocation17] sm:$0xff] %v2014_v15  ;;  %2341 = vtanh.f32 %v2014_v15 }
 0x86f   :  { %v2342_v13 = vpop.eup %2341 }
 0x870   :  { %v2016_v12 = vmul.f32 %v2342_v13, %v2340_v5 }
 0x872   :  { %2018 = vst [vmem:[#allocation14 + $0x38] sm:$0xff] %v2016_v12  ;;  %2024 = vst [vmem:[#allocation15] sm:$0xff] %v2016_v12 }
 0x873   :  { %2486 = shalt.err (!%p2483_p1)
}
 0x874   :  { %2047 = dma.vmem_to_hbm [thread:$0]  %s2045_s30, 128, %s3281_s7, [#allocation16]  }
 0x875   :  { %s2495_s17 = scalar_lea.vmem %s2032_s11, 1024  ;;  %p2500_p3 = scmp.lt.s32.totalorder %s2032_s11, %s2032_s11 }
 0x876   :  { %p2496_p2 = scmp.ne.s32.totalorder %s2032_s11, %s2495_s17  ;;  %p2501_p4 = scmp.lt.s32.totalorder %s2495_s17, %s2495_s17 }
 0x878   :  { %p2502_p5 = por %p2501_p4, %p2500_p3 }
 0x87a   :  { %p2503_p6 = pnand %p2502_p5, %p2496_p2 }
 0x87c   :  { %2506 = shalt.err (!%p2503_p6)
}
 0x87d   :  { %2037 = dma.vmem_to_hbm [thread:$0]  %s2032_s11, 1024, %s3280_s6, [#allocation7], %s2550_s1, %s2550_s1, %s2551_s20  }
 0x87e   :  { %s2515_s21 = scalar_lea.vmem %s2055_s13, 128  ;;  %p2520_p8 = scmp.lt.s32.totalorder %s2055_s13, %s2055_s13 }
 0x87f   :  { %p2516_p7 = scmp.ne.s32.totalorder %s2055_s13, %s2515_s21  ;;  %p2521_p9 = scmp.lt.s32.totalorder %s2515_s21, %s2515_s21 }
 0x881   :  { %p2522_p10 = por %p2521_p9, %p2520_p8 }
 0x883   :  { %p2523_p11 = pnand %p2522_p10, %p2516_p7 }
 0x885   :  { %2526 = shalt.err (!%p2523_p11)
}
 0x886   :  { %2057 = dma.vmem_to_hbm [thread:$0]  %s2055_s13, 128, %s3282_s8, [#allocation16]  }
 0x887   :  { %2541 = dma.done.wait [#allocation7], 1024  }
 0x888   :  { %2542 = vsyncadd [#allocation7], 4294966272 }
 0x889   :  { %2543 = dma.done.wait [#allocation16], 256  }
 0x88a   :  { %2544 = vsyncadd [#allocation16], 4294967040 }
 0x88b   :  { %2067 = vsyncpa [#allocation6], 1 }
 0x88c   :  { %2068 = vsyncpa [#allocation9], 1 }
 0x88d   :  { %2069 = vsyncpa [#allocation12], 1 }
 0x88e   :  { %2070 = vsyncpa [#allocation7], 1 }
 0x88f   :  { %2071 = vsyncpa [#allocation16], 1 }

</bundles_post_ra>
